<compile_context>
chip_gen: v5e
topology: v5e:2x2
jax: 0.10.0
libtpu: 0.0.40
codegen_flags: <defaults>
</compile_context>

<pallas_src>
import functools
import math

import jax
import jax.numpy as jnp
import numpy as np
from jax.experimental import pallas as pl
from jax.experimental.pallas import tpu as pltpu

_NEG_INF = -1e30
_VMEM_LIMIT = 32 * 1024 * 1024  # raise v5e's 16 MiB default; matches v6e/v7x default


def _concat_heads(parts):
    return parts[0] if len(parts) == 1 else jnp.concatenate(parts, axis=-1)


def _rotate_half_perm(t, first_half_mask, dh):
    """rotate_half in the per-head deinterleaved ([evens | odds]) feature layout.

    In that layout rotate_half(x) == concat(-x_odd, x_even), i.e. a half-roll with
    a sign flip on the first half.  A roll by dh//2 is shift-direction agnostic and
    lowers to XLU lane rotates (no MXU work).
    """
    z = pltpu.roll(t, dh // 2, axis=1)
    return jnp.where(first_half_mask, -z, z)


# ----------------------------------------------------------------------------
# Kernel A: fused LayerNorm + QKV projection + rotary embedding application
# ----------------------------------------------------------------------------
def _ln_qkv_rope_kernel(x_ref, g_ref, b_ref, w_ref, emb_ref,
                        q_ref, k_ref, v_ref,
                        *, heads, dh, scale, rotate_value, eps, mm_dtype):
    inner = heads * dh

    # LayerNorm (f32 statistics, PyTorch eps placement)
    x = x_ref[...].astype(jnp.float32)
    mean = jnp.mean(x, axis=-1, keepdims=True)
    var = jnp.mean(jnp.square(x - mean), axis=-1, keepdims=True)
    xn = (x - mean) * jax.lax.rsqrt(var + eps)
    xn = xn * g_ref[...].astype(jnp.float32) + b_ref[...].astype(jnp.float32)

    # QKV projection (no bias in the module)
    qkv = jnp.dot(xn.astype(mm_dtype), w_ref[...].astype(mm_dtype),
                  preferred_element_type=jnp.float32)           # (tm, 3*inner)

    # rotary angles for these rows (already column-permuted to [evens | odds])
    emb = emb_ref[...].astype(jnp.float32)                      # (tm, dh)
    cos = jnp.cos(emb)
    sin = jnp.sin(emb)
    first_half = jax.lax.broadcasted_iota(jnp.int32, emb.shape, 1) < (dh // 2)

    def rotate(t):
        return t * cos + _rotate_half_perm(t, first_half, dh) * sin

    q_parts, k_parts, v_parts = [], [], []
    for h in range(heads):
        qh = qkv[:, h * dh:(h + 1) * dh]
        kh = qkv[:, inner + h * dh:inner + (h + 1) * dh]
        vh = qkv[:, 2 * inner + h * dh:2 * inner + (h + 1) * dh]
        q_parts.append(rotate(qh) * scale)          # fold 1/sqrt(dh) into q here
        k_parts.append(rotate(kh))
        v_parts.append(rotate(vh) if rotate_value else vh)

    q_ref[...] = _concat_heads(q_parts).astype(q_ref.dtype)
    k_ref[...] = _concat_heads(k_parts).astype(k_ref.dtype)
    v_ref[...] = _concat_heads(v_parts).astype(v_ref.dtype)


def ln_qkv_rope(x2d, gamma, beta, w_qkv_p, emb_p, *, heads, dh, scale,
                rotate_value, row_tile, mm_dtype, eps=1e-5):
    M, D = x2d.shape
    inner = heads * dh
    tm = min(row_tile, M)
    kernel = functools.partial(_ln_qkv_rope_kernel, heads=heads, dh=dh,
                               scale=scale, rotate_value=rotate_value,
                               eps=eps, mm_dtype=mm_dtype)
    return pl.pallas_call(
        kernel,
        out_shape=tuple(jax.ShapeDtypeStruct((M, inner), x2d.dtype)
                        for _ in range(3)),
        grid=(pl.cdiv(M, tm),),
        in_specs=[
            pl.BlockSpec((tm, D), lambda i: (i, 0)),
            pl.BlockSpec((1, D), lambda i: (0, 0)),
            pl.BlockSpec((1, D), lambda i: (0, 0)),
            pl.BlockSpec((D, 3 * inner), lambda i: (0, 0)),   # weight stays resident
            pl.BlockSpec((tm, dh), lambda i: (i, 0)),
        ],
        out_specs=tuple(pl.BlockSpec((tm, inner), lambda i: (i, 0))
                        for _ in range(3)),
        compiler_params=pltpu.CompilerParams(
            dimension_semantics=("parallel",),
            vmem_limit_bytes=_VMEM_LIMIT,
        ),
    )(x2d, gamma.reshape(1, D), beta.reshape(1, D), w_qkv_p, emb_p)


# ----------------------------------------------------------------------------
# Kernel B: flash attention over (B, q_tiles, kv_tiles), heads batched per step
# ----------------------------------------------------------------------------
def _flash_attn_kernel(mask_ref, q_ref, k_ref, v_ref, o_ref,
                       m_sc, l_sc, acc_sc,
                       *, heads, dh, seq_len, kv_tile, mm_dtype):
    ki = pl.program_id(2)
    nk = pl.num_programs(2)

    @pl.when(ki == 0)
    def _init():
        m_sc[...] = jnp.full_like(m_sc, -jnp.inf)
        l_sc[...] = jnp.zeros_like(l_sc)
        acc_sc[...] = jnp.zeros_like(acc_sc)

    # key-side validity: user mask AND in-bounds (guards a ragged last kv tile)
    col = ki * kv_tile + jax.lax.broadcasted_iota(jnp.int32, (1, kv_tile), 1)
    kmask = (mask_ref[0] > 0.5) & (col < seq_len)               # (1, tk) bool

    q = q_ref[0]            # (tq, H*dh), already rotated and pre-scaled
    k = k_ref[0]            # (tk, H*dh)
    v = v_ref[0]            # (tk, H*dh)

    for h in range(heads):
        sl = slice(h * dh, (h + 1) * dh)
        qh = q[:, sl].astype(mm_dtype)
        kh = k[:, sl].astype(mm_dtype)
        vh = v[:, sl].astype(mm_dtype)

        s = jnp.dot(qh, kh.T, preferred_element_type=jnp.float32)   # (tq, tk)
        s = jnp.where(kmask, s, _NEG_INF)

        m_prev = m_sc[h]                                            # (tq, 1)
        m_new = jnp.maximum(m_prev, jnp.max(s, axis=-1, keepdims=True))
        alpha = jnp.exp(m_prev - m_new)
        p = jnp.exp(s - m_new)                                      # (tq, tk)
        l_sc[h] = alpha * l_sc[h] + jnp.sum(p, axis=-1, keepdims=True)
        acc_sc[h] = alpha * acc_sc[h] + jnp.dot(
            p.astype(mm_dtype), vh, preferred_element_type=jnp.float32)
        m_sc[h] = m_new

    @pl.when(ki == nk - 1)
    def _finalize():
        # deferred softmax normalization: one (tq, dh) scale per head, EUP recip
        parts = [acc_sc[h] * pl.reciprocal(l_sc[h], approx=True)
                 for h in range(heads)]
        o_ref[0] = _concat_heads(parts).astype(o_ref.dtype)


def flash_attention(mask3d, q, k, v, *, heads, dh, q_tile, kv_tile, mm_dtype):
    B, N, inner = q.shape
    tq = min(q_tile, N)
    tk = min(kv_tile, N)
    kernel = functools.partial(_flash_attn_kernel, heads=heads, dh=dh,
                               seq_len=N, kv_tile=tk, mm_dtype=mm_dtype)
    return pl.pallas_call(
        kernel,
        out_shape=jax.ShapeDtypeStruct((B, N, inner), q.dtype),
        grid=(B, pl.cdiv(N, tq), pl.cdiv(N, tk)),
        in_specs=[
            pl.BlockSpec((1, 1, tk), lambda b, qi, ki: (b, 0, ki)),
            pl.BlockSpec((1, tq, inner), lambda b, qi, ki: (b, qi, 0)),
            pl.BlockSpec((1, tk, inner), lambda b, qi, ki: (b, ki, 0)),
            pl.BlockSpec((1, tk, inner), lambda b, qi, ki: (b, ki, 0)),
        ],
        out_specs=pl.BlockSpec((1, tq, inner), lambda b, qi, ki: (b, qi, 0)),
        scratch_shapes=[
            pltpu.VMEM((heads, tq, 1), jnp.float32),    # running max m
            pltpu.VMEM((heads, tq, 1), jnp.float32),    # running denom l
            pltpu.VMEM((heads, tq, dh), jnp.float32),   # unnormalized accumulator
        ],
        compiler_params=pltpu.CompilerParams(
            dimension_semantics=("parallel", "parallel", "arbitrary"),
            vmem_limit_bytes=_VMEM_LIMIT,
        ),
    )(mask3d, q, k, v)


# ----------------------------------------------------------------------------
# Kernel C: fused inverse rotary (rotate_value=True) + output projection
# ----------------------------------------------------------------------------
def _inv_rope_out_proj_kernel(x_ref, emb_ref, w_ref, b_ref, o_ref,
                              *, heads, dh, rotate_value, mm_dtype):
    x = x_ref[...].astype(jnp.float32)                           # (tm, H*dh)
    if rotate_value:
        emb = emb_ref[...].astype(jnp.float32)                   # (tm, dh)
        cos = jnp.cos(emb)
        sin = jnp.sin(emb)
        first_half = jax.lax.broadcasted_iota(jnp.int32, emb.shape, 1) < (dh // 2)
        parts = []
        for h in range(heads):
            xh = x[:, h * dh:(h + 1) * dh]
            # inverse rotation: cos(-e) = cos(e), sin(-e) = -sin(e)
            parts.append(xh * cos - _rotate_half_perm(xh, first_half, dh) * sin)
        x = _concat_heads(parts)

    out = jnp.dot(x.astype(mm_dtype), w_ref[...].astype(mm_dtype),
                  preferred_element_type=jnp.float32)
    o_ref[...] = (out + b_ref[...].astype(jnp.float32)).astype(o_ref.dtype)


def inv_rope_out_proj(x2d, emb_p, w_out_p, b_out, *, heads, dh, rotate_value,
                      row_tile, mm_dtype):
    M, inner = x2d.shape
    D = w_out_p.shape[1]
    tm = min(row_tile, M)
    kernel = functools.partial(_inv_rope_out_proj_kernel, heads=heads, dh=dh,
                               rotate_value=rotate_value, mm_dtype=mm_dtype)
    return pl.pallas_call(
        kernel,
        out_shape=jax.ShapeDtypeStruct((M, D), x2d.dtype),
        grid=(pl.cdiv(M, tm),),
        in_specs=[
            pl.BlockSpec((tm, inner), lambda i: (i, 0)),
            pl.BlockSpec((tm, dh), lambda i: (i, 0)),
            pl.BlockSpec((inner, D), lambda i: (0, 0)),
            pl.BlockSpec((1, D), lambda i: (0, 0)),
        ],
        out_specs=pl.BlockSpec((tm, D), lambda i: (i, 0)),
        compiler_params=pltpu.CompilerParams(
            dimension_semantics=("parallel",),
            vmem_limit_bytes=_VMEM_LIMIT,
        ),
    )(x2d, emb_p, w_out_p, b_out.reshape(1, D))


# ----------------------------------------------------------------------------
# Glue: parameter setup and module-level forward
# ----------------------------------------------------------------------------
def init_params(key, dim, heads, dim_head):
    inner = heads * dim_head
    k1, k2, k3 = jax.random.split(key, 3)
    return {
        "ln_gamma": jnp.ones((dim,), jnp.float32),
        "ln_beta": jnp.zeros((dim,), jnp.float32),
        # stored pre-transposed: y = x @ W
        "w_qkv": 0.05 * jax.random.normal(k1, (dim, 3 * inner), jnp.float32),
        "w_out": 0.05 * jax.random.normal(k2, (inner, dim), jnp.float32),
        "b_out": 0.01 * jax.random.normal(k3, (dim,), jnp.float32),
    }


def rotary_self_attention_forward(params, x, rotary_time_emb, x_mask=None, *,
                                  heads, dim_head, rotate_value,
                                  row_tile=256, q_tile=128, kv_tile=128,
                                  mm_dtype=jnp.float32):
    # TODO(synk): dropout not implemented (inference path, dropout_p == 0).
    # TODO(synk): forward_varlen (block-diagonal / ragged sequences) not implemented.
    B, N, D = x.shape
    dh = dim_head
    inner = heads * dh
    M = B * N
    scale = 1.0 / math.sqrt(dh)

    # Per-head deinterleave permutation [0,2,4,...,1,3,5,...].  Folding it into the
    # projection weights and the rotary angles turns interleaved-pair rotate_half
    # into a half-roll inside the kernels; attention scores are invariant to the
    # (consistent) per-head permutation and W_out's rows are permuted to undo it.
    perm = np.concatenate([np.arange(0, dh, 2), np.arange(1, dh, 2)])
    head_perm = np.concatenate([h * dh + perm for h in range(heads)])
    qkv_perm = np.concatenate([t * inner + head_perm for t in range(3)])

    w_qkv_p = params["w_qkv"][:, qkv_perm]        # (D, 3*inner), permuted columns
    w_out_p = params["w_out"][head_perm, :]       # (inner, D), permuted rows
    emb_p = rotary_time_emb.reshape(M, dh)[:, perm]

    q, k, v = ln_qkv_rope(
        x.reshape(M, D), params["ln_gamma"], params["ln_beta"], w_qkv_p, emb_p,
        heads=heads, dh=dh, scale=scale, rotate_value=rotate_value,
        row_tile=row_tile, mm_dtype=mm_dtype)
    q = q.reshape(B, N, inner)
    k = k.reshape(B, N, inner)
    v = v.reshape(B, N, inner)

    if x_mask is None:
        mask3d = jnp.ones((B, 1, N), jnp.float32)
    else:
        mask3d = x_mask.astype(jnp.float32).reshape(B, 1, N)

    attn = flash_attention(mask3d, q, k, v, heads=heads, dh=dh,
                           q_tile=q_tile, kv_tile=kv_tile, mm_dtype=mm_dtype)

    out = inv_rope_out_proj(attn.reshape(M, inner), emb_p,
                            w_out_p, params["b_out"],
                            heads=heads, dh=dh, rotate_value=rotate_value,
                            row_tile=row_tile, mm_dtype=mm_dtype)
    return out.reshape(B, N, D)


# ----------------------------------------------------------------------------
# Pure-JAX reference (mirrors the PyTorch forward) for a correctness check
# ----------------------------------------------------------------------------
def reference_forward(params, x, emb, x_mask, *, heads, dim_head, rotate_value):
    B, N, D = x.shape
    mean = x.mean(-1, keepdims=True)
    var = ((x - mean) ** 2).mean(-1, keepdims=True)
    xn = (x - mean) / jnp.sqrt(var + 1e-5) * params["ln_gamma"] + params["ln_beta"]
    qkv = xn @ params["w_qkv"]
    q, k, v = jnp.split(qkv, 3, axis=-1)

    def to_heads(t):
        return t.reshape(B, N, heads, dim_head).transpose(0, 2, 1, 3)

    q, k, v = map(to_heads, (q, k, v))
    e = emb[:, None, :, :]
    cos, sin = jnp.cos(e), jnp.sin(e)

    def rh(t):
        t2 = t.reshape(*t.shape[:-1], dim_head // 2, 2)
        x1, x2 = t2[..., 0], t2[..., 1]
        return jnp.stack((-x2, x1), axis=-1).reshape(t.shape)

    def rot(t, sign):
        return t * cos + rh(t) * (sign * sin)

    q, k = rot(q, 1.0), rot(k, 1.0)
    if rotate_value:
        v = rot(v, 1.0)
    s = jnp.einsum("bhqd,bhkd->bhqk", q, k) / jnp.sqrt(dim_head)
    if x_mask is not None:
        s = jnp.where(x_mask[:, None, None, :], s, -1e30)
    a = jax.nn.softmax(s, axis=-1)
    o = jnp.einsum("bhqk,bhkd->bhqd", a, v)
    if rotate_value:
        o = rot(o, -1.0)
    o = o.transpose(0, 2, 1, 3).reshape(B, N, heads * dim_head)
    return o @ params["w_out"] + params["b_out"]


if __name__ == "__main__":
    B, N, D = 2, 16, 64
    heads, dim_head = 2, 128
    rotate_value = True

    key = jax.random.PRNGKey(0)
    k_p, k_x, k_e = jax.random.split(key, 3)
    params = init_params(k_p, D, heads, dim_head)

    x = jax.random.normal(k_x, (B, N, D), jnp.float32)
    rotary_time_emb = jax.random.uniform(
        k_e, (B, N, dim_head), jnp.float32, minval=0.0, maxval=6.0
    )
    # boolean key mask: True = attend (leave every row with plenty of valid keys)
    x_mask = jnp.ones((B, N), dtype=bool).at[0, -2:].set(False).at[1, 0].set(False)

    out = rotary_self_attention_forward(
        params, x, rotary_time_emb, x_mask,
        heads=heads, dim_head=dim_head, rotate_value=rotate_value,
    )
    out = jax.block_until_ready(out)

    ref = reference_forward(
        params, x, rotary_time_emb, x_mask,
        heads=heads, dim_head=dim_head, rotate_value=rotate_value,
    )
    np.testing.assert_allclose(np.asarray(out), np.asarray(ref), rtol=3e-3, atol=3e-3)

    print("KERNEL_OK")
</pallas_src>

<mosaic_0001>
module attributes {stable_mosaic.version = 11 : i64} {
  func.func @_ln_qkv_rope_kernel(%arg0: i32, %arg1: memref<32x64xf32, #tpu.memory_space<vmem>>, %arg2: memref<1x64xf32, #tpu.memory_space<vmem>>, %arg3: memref<1x64xf32, #tpu.memory_space<vmem>>, %arg4: memref<64x768xf32, #tpu.memory_space<vmem>>, %arg5: memref<32x128xf32, #tpu.memory_space<vmem>>, %arg6: memref<32x256xf32, #tpu.memory_space<vmem>>, %arg7: memref<32x256xf32, #tpu.memory_space<vmem>>, %arg8: memref<32x256xf32, #tpu.memory_space<vmem>>) attributes {dimension_semantics = [#tpu.dimension_semantics<parallel>], iteration_bounds = array<i64: 1>, scalar_prefetch = 0 : i64, scratch_operands = 0 : i64, tpu.core_type = #tpu.core_type<tc>, window_params = [{transform_indices = @transform_0, window_bounds = array<i64: 32, 64>}, {pipeline_mode = #tpu.pipeline_mode<synchronous>, transform_indices = @transform_1, window_bounds = array<i64: 1, 64>}, {pipeline_mode = #tpu.pipeline_mode<synchronous>, transform_indices = @transform_2, window_bounds = array<i64: 1, 64>}, {pipeline_mode = #tpu.pipeline_mode<synchronous>, transform_indices = @transform_3, window_bounds = array<i64: 64, 768>}, {transform_indices = @transform_4, window_bounds = array<i64: 32, 128>}, {transform_indices = @transform_5, window_bounds = array<i64: 32, 256>}, {transform_indices = @transform_6, window_bounds = array<i64: 32, 256>}, {transform_indices = @transform_7, window_bounds = array<i64: 32, 256>}]} {
    %c0 = arith.constant 0 : index
    %c0_0 = arith.constant 0 : index
    %0 = vector.load %arg1[%c0, %c0_0] : memref<32x64xf32, #tpu.memory_space<vmem>>, vector<32x64xf32>
    %cst = arith.constant dense<0.000000e+00> : vector<32xf32>
    %1 = vector.multi_reduction <add>, %0, %cst [1] : vector<32x64xf32> to vector<32xf32>
    %2 = vector.shape_cast %1 : vector<32xf32> to vector<32x1xf32>
    %cst_1 = arith.constant 6.400000e+01 : f32
    %3 = vector.broadcast %cst_1 : f32 to vector<32x1xf32>
    %4 = arith.divf %2, %3 : vector<32x1xf32>
    %5 = vector.broadcast %4 : vector<32x1xf32> to vector<32x64xf32>
    %6 = arith.subf %0, %5 : vector<32x64xf32>
    %7 = arith.mulf %6, %6 : vector<32x64xf32>
    %cst_2 = arith.constant dense<0.000000e+00> : vector<32xf32>
    %8 = vector.multi_reduction <add>, %7, %cst_2 [1] : vector<32x64xf32> to vector<32xf32>
    %9 = vector.shape_cast %8 : vector<32xf32> to vector<32x1xf32>
    %cst_3 = arith.constant 6.400000e+01 : f32
    %10 = vector.broadcast %cst_3 : f32 to vector<32x1xf32>
    %11 = arith.divf %9, %10 : vector<32x1xf32>
    %12 = vector.broadcast %4 : vector<32x1xf32> to vector<32x64xf32>
    %13 = arith.subf %0, %12 : vector<32x64xf32>
    %cst_4 = arith.constant 9.99999974E-6 : f32
    %14 = vector.broadcast %cst_4 : f32 to vector<32x1xf32>
    %15 = arith.addf %11, %14 : vector<32x1xf32>
    %16 = math.rsqrt %15 : vector<32x1xf32>
    %17 = vector.broadcast %16 : vector<32x1xf32> to vector<32x64xf32>
    %18 = arith.mulf %13, %17 : vector<32x64xf32>
    %c0_5 = arith.constant 0 : index
    %c0_6 = arith.constant 0 : index
    %19 = vector.load %arg2[%c0_5, %c0_6] : memref<1x64xf32, #tpu.memory_space<vmem>>, vector<1x64xf32>
    %20 = vector.broadcast %19 : vector<1x64xf32> to vector<32x64xf32>
    %21 = arith.mulf %18, %20 : vector<32x64xf32>
    %c0_7 = arith.constant 0 : index
    %c0_8 = arith.constant 0 : index
    %22 = vector.load %arg3[%c0_7, %c0_8] : memref<1x64xf32, #tpu.memory_space<vmem>>, vector<1x64xf32>
    %23 = vector.broadcast %22 : vector<1x64xf32> to vector<32x64xf32>
    %24 = arith.addf %21, %23 : vector<32x64xf32>
    %c0_9 = arith.constant 0 : index
    %c0_10 = arith.constant 0 : index
    %25 = vector.load %arg4[%c0_9, %c0_10] : memref<64x768xf32, #tpu.memory_space<vmem>>, vector<64x768xf32>
    %cst_11 = arith.constant dense<0.000000e+00> : vector<32x768xf32>
    %26 = tpu.matmul %24, %25, %cst_11 {dimension_numbers = #tpu.dot_dimension_numbers<[1], [0], [0], [1], [0, 0, 1, 1], [], []>} : vector<32x64xf32>, vector<64x768xf32>, vector<32x768xf32> -> vector<32x768xf32>
    %c0_12 = arith.constant 0 : index
    %c0_13 = arith.constant 0 : index
    %27 = vector.load %arg5[%c0_12, %c0_13] : memref<32x128xf32, #tpu.memory_space<vmem>>, vector<32x128xf32>
    %28 = math.cos %27 : vector<32x128xf32>
    %29 = math.sin %27 : vector<32x128xf32>
    %30 = tpu.iota {dimensions = array<i32: 1>} : vector<32x128xi32>
    %c64_i32 = arith.constant 64 : i32
    %31 = vector.broadcast %c64_i32 : i32 to vector<32x128xi32>
    %32 = arith.cmpi slt, %30, %31 : vector<32x128xi32>
    %33 = vector.extract_strided_slice %26 {offsets = [0, 0], sizes = [32, 128], strides = [1, 1]} : vector<32x768xf32> to vector<32x128xf32>
    %34 = vector.extract_strided_slice %26 {offsets = [0, 256], sizes = [32, 128], strides = [1, 1]} : vector<32x768xf32> to vector<32x128xf32>
    %35 = vector.extract_strided_slice %26 {offsets = [0, 512], sizes = [32, 128], strides = [1, 1]} : vector<32x768xf32> to vector<32x128xf32>
    %36 = arith.mulf %33, %28 : vector<32x128xf32>
    %c64_i32_14 = arith.constant 64 : i32
    %37 = tpu.dynamic_rotate %33 by %c64_i32_14 dim 1 : vector<32x128xf32>, i32 -> vector<32x128xf32>
    %cst_15 = arith.constant 0.000000e+00 : f32
    %38 = vector.broadcast %cst_15 : f32 to vector<32x128xf32>
    %39 = arith.subf %38, %37 : vector<32x128xf32>
    %40 = arith.select %32, %39, %37 : vector<32x128xi1>, vector<32x128xf32>
    %41 = arith.mulf %40, %29 : vector<32x128xf32>
    %42 = arith.addf %36, %41 : vector<32x128xf32>
    %cst_16 = arith.constant 0.0883883461 : f32
    %43 = vector.broadcast %cst_16 : f32 to vector<32x128xf32>
    %44 = arith.mulf %42, %43 : vector<32x128xf32>
    %45 = arith.mulf %34, %28 : vector<32x128xf32>
    %c64_i32_17 = arith.constant 64 : i32
    %46 = tpu.dynamic_rotate %34 by %c64_i32_17 dim 1 : vector<32x128xf32>, i32 -> vector<32x128xf32>
    %cst_18 = arith.constant 0.000000e+00 : f32
    %47 = vector.broadcast %cst_18 : f32 to vector<32x128xf32>
    %48 = arith.subf %47, %46 : vector<32x128xf32>
    %49 = arith.select %32, %48, %46 : vector<32x128xi1>, vector<32x128xf32>
    %50 = arith.mulf %49, %29 : vector<32x128xf32>
    %51 = arith.addf %45, %50 : vector<32x128xf32>
    %52 = arith.mulf %35, %28 : vector<32x128xf32>
    %c64_i32_19 = arith.constant 64 : i32
    %53 = tpu.dynamic_rotate %35 by %c64_i32_19 dim 1 : vector<32x128xf32>, i32 -> vector<32x128xf32>
    %cst_20 = arith.constant 0.000000e+00 : f32
    %54 = vector.broadcast %cst_20 : f32 to vector<32x128xf32>
    %55 = arith.subf %54, %53 : vector<32x128xf32>
    %56 = arith.select %32, %55, %53 : vector<32x128xi1>, vector<32x128xf32>
    %57 = arith.mulf %56, %29 : vector<32x128xf32>
    %58 = arith.addf %52, %57 : vector<32x128xf32>
    %59 = vector.extract_strided_slice %26 {offsets = [0, 128], sizes = [32, 128], strides = [1, 1]} : vector<32x768xf32> to vector<32x128xf32>
    %60 = vector.extract_strided_slice %26 {offsets = [0, 384], sizes = [32, 128], strides = [1, 1]} : vector<32x768xf32> to vector<32x128xf32>
    %61 = vector.extract_strided_slice %26 {offsets = [0, 640], sizes = [32, 128], strides = [1, 1]} : vector<32x768xf32> to vector<32x128xf32>
    %62 = arith.mulf %59, %28 : vector<32x128xf32>
    %c64_i32_21 = arith.constant 64 : i32
    %63 = tpu.dynamic_rotate %59 by %c64_i32_21 dim 1 : vector<32x128xf32>, i32 -> vector<32x128xf32>
    %cst_22 = arith.constant 0.000000e+00 : f32
    %64 = vector.broadcast %cst_22 : f32 to vector<32x128xf32>
    %65 = arith.subf %64, %63 : vector<32x128xf32>
    %66 = arith.select %32, %65, %63 : vector<32x128xi1>, vector<32x128xf32>
    %67 = arith.mulf %66, %29 : vector<32x128xf32>
    %68 = arith.addf %62, %67 : vector<32x128xf32>
    %cst_23 = arith.constant 0.0883883461 : f32
    %69 = vector.broadcast %cst_23 : f32 to vector<32x128xf32>
    %70 = arith.mulf %68, %69 : vector<32x128xf32>
    %71 = arith.mulf %60, %28 : vector<32x128xf32>
    %c64_i32_24 = arith.constant 64 : i32
    %72 = tpu.dynamic_rotate %60 by %c64_i32_24 dim 1 : vector<32x128xf32>, i32 -> vector<32x128xf32>
    %cst_25 = arith.constant 0.000000e+00 : f32
    %73 = vector.broadcast %cst_25 : f32 to vector<32x128xf32>
    %74 = arith.subf %73, %72 : vector<32x128xf32>
    %75 = arith.select %32, %74, %72 : vector<32x128xi1>, vector<32x128xf32>
    %76 = arith.mulf %75, %29 : vector<32x128xf32>
    %77 = arith.addf %71, %76 : vector<32x128xf32>
    %78 = arith.mulf %61, %28 : vector<32x128xf32>
    %c64_i32_26 = arith.constant 64 : i32
    %79 = tpu.dynamic_rotate %61 by %c64_i32_26 dim 1 : vector<32x128xf32>, i32 -> vector<32x128xf32>
    %cst_27 = arith.constant 0.000000e+00 : f32
    %80 = vector.broadcast %cst_27 : f32 to vector<32x128xf32>
    %81 = arith.subf %80, %79 : vector<32x128xf32>
    %82 = arith.select %32, %81, %79 : vector<32x128xi1>, vector<32x128xf32>
    %83 = arith.mulf %82, %29 : vector<32x128xf32>
    %84 = arith.addf %78, %83 : vector<32x128xf32>
    %85 = tpu.concatenate %44, %70 in 1 : vector<32x128xf32>, vector<32x128xf32> -> vector<32x256xf32>
    %c0_28 = arith.constant 0 : index
    %c0_29 = arith.constant 0 : index
    %86 = vector.load %arg6[%c0_28, %c0_29] : memref<32x256xf32, #tpu.memory_space<vmem>>, vector<32x256xf32>
    tpu.vector_store %arg6[%c0_28, %c0_29], %85 {strides = array<i32>} : memref<32x256xf32, #tpu.memory_space<vmem>>, vector<32x256xf32>,
    %87 = tpu.concatenate %51, %77 in 1 : vector<32x128xf32>, vector<32x128xf32> -> vector<32x256xf32>
    %c0_30 = arith.constant 0 : index
    %c0_31 = arith.constant 0 : index
    %88 = vector.load %arg7[%c0_30, %c0_31] : memref<32x256xf32, #tpu.memory_space<vmem>>, vector<32x256xf32>
    tpu.vector_store %arg7[%c0_30, %c0_31], %87 {strides = array<i32>} : memref<32x256xf32, #tpu.memory_space<vmem>>, vector<32x256xf32>,
    %89 = tpu.concatenate %58, %84 in 1 : vector<32x128xf32>, vector<32x128xf32> -> vector<32x256xf32>
    %c0_32 = arith.constant 0 : index
    %c0_33 = arith.constant 0 : index
    %90 = vector.load %arg8[%c0_32, %c0_33] : memref<32x256xf32, #tpu.memory_space<vmem>>, vector<32x256xf32>
    tpu.vector_store %arg8[%c0_32, %c0_33], %89 {strides = array<i32>} : memref<32x256xf32, #tpu.memory_space<vmem>>, vector<32x256xf32>,
    return
  }
  func.func @transform_0(%arg0: i32) -> (i32, i32) {
    %c0_i32 = arith.constant 0 : i32
    %c0_i32_0 = arith.constant 0 : i32
    return %arg0, %c0_i32 : i32, i32
  }
  func.func @transform_1(%arg0: i32) -> (i32, i32) {
    %c0_i32 = arith.constant 0 : i32
    %c0_i32_0 = arith.constant 0 : i32
    %c0_i32_1 = arith.constant 0 : i32
    return %c0_i32, %c0_i32_0 : i32, i32
  }
  func.func @transform_2(%arg0: i32) -> (i32, i32) {
    %c0_i32 = arith.constant 0 : i32
    %c0_i32_0 = arith.constant 0 : i32
    %c0_i32_1 = arith.constant 0 : i32
    return %c0_i32, %c0_i32_0 : i32, i32
  }
  func.func @transform_3(%arg0: i32) -> (i32, i32) {
    %c0_i32 = arith.constant 0 : i32
    %c0_i32_0 = arith.constant 0 : i32
    %c0_i32_1 = arith.constant 0 : i32
    return %c0_i32, %c0_i32_0 : i32, i32
  }
  func.func @transform_4(%arg0: i32) -> (i32, i32) {
    %c0_i32 = arith.constant 0 : i32
    %c0_i32_0 = arith.constant 0 : i32
    return %arg0, %c0_i32 : i32, i32
  }
  func.func @transform_5(%arg0: i32) -> (i32, i32) {
    %c0_i32 = arith.constant 0 : i32
    %c0_i32_0 = arith.constant 0 : i32
    return %arg0, %c0_i32 : i32, i32
  }
  func.func @transform_6(%arg0: i32) -> (i32, i32) {
    %c0_i32 = arith.constant 0 : i32
    %c0_i32_0 = arith.constant 0 : i32
    return %arg0, %c0_i32 : i32, i32
  }
  func.func @transform_7(%arg0: i32) -> (i32, i32) {
    %c0_i32 = arith.constant 0 : i32
    %c0_i32_0 = arith.constant 0 : i32
    return %arg0, %c0_i32 : i32, i32
  }
}

</mosaic_0001>

<bundles_post_ra>
// kernel: tpu_custom_call.1
= control target key start
LH: loop header
LB: loop body
LE: loop exit
PB: predicated region body
PF: predicated region fallthrough
CT: control target
= control target key end

     0   :  { %13 = vsyncpa [#allocation3], 0  ;;  %s3240_s0 = inlined_call_operand.hbm [shape: f32[32,64], index: 0, kind: input, shape index: {}]   ;;  %s3241_s1 = inlined_call_operand.hbm [shape: f32[1,64], index: 1, kind: input, shape index: {}]   ;;  %s3242_s2 = inlined_call_operand.vmem [shape: f32[1,64], index: 2, kind: input, shape index: {}]   ;;  %s3243_s3 = inlined_call_operand.hbm [shape: f32[64,768], index: 3, kind: input, shape index: {}]   ;;  %s3244_s4 = inlined_call_operand.hbm [shape: f32[32,128], index: 4, kind: input, shape index: {}]   ;;  %s3245_s5 = inlined_call_operand.hbm [shape: f32[32,256], index: 5, kind: output, shape index: {0}]   ;;  %s3246_s6 = inlined_call_operand.hbm [shape: f32[32,256], index: 6, kind: output, shape index: {1}]   ;;  %s3247_s7 = inlined_call_operand.hbm [shape: f32[32,256], index: 7, kind: output, shape index: {2}]  }
   0x1   :  { %14 = vsyncpa [#allocation6], 0 }
   0x2   :  { %15 = vsyncpa [#allocation9], 0 }
   0x3   :  { %16 = vsyncpa [#allocation4], 0  ;;  %s36_s26 = sshll.u32 %s3241_s1, 4  ;;  %s37_s26 = int_to_ptr.hbm [resolvable:$true] %s36_s26 }
   0x4   :  { %17 = vsyncpa [#allocation12], 0  ;;  %s2214_s27 = smov [#allocation5]   ;;  %s22_s8 = sshll.u32 %s3240_s0, 4  ;;  %s23_s8 = int_to_ptr.hbm [resolvable:$true] %s22_s8 }
   0x5   :  { %s38_s28 = sshll.u32 %s2214_s27, 4  ;;  %s2215_s9 = smov [#allocation2]   ;;  %s39_s28 = int_to_ptr.vmem [resolvable:$true] %s38_s28 }
   0x6   :  { %41 = dma.hbm_to_vmem [thread:$0]  %s37_s26, 16, %s39_s28, [#allocation6]  }
   0x7   :  { %s24_s10 = sshll.u32 %s2215_s9, 4  ;;  %s2216_s11 = smov 128   ;;  %s25_s10 = int_to_ptr.vmem [resolvable:$true] %s24_s10 }
   0x8   :  { %s2217_s12 = smov 8   ;;  %s48_s1 = sshll.u32 %s3243_s3, 4  ;;  %s49_s1 = int_to_ptr.hbm [resolvable:$true] %s48_s1 }
   0x9   :  { %30 = dma.hbm_to_vmem [thread:$0]  %s23_s8, 512, %s25_s10, [#allocation3], %s2216_s11, %s2216_s11, %s2217_s12  }
   0xa   :  { %s2218_s15 = smov [#allocation7]   ;;  %s61_s0 = sshll.u32 %s3244_s4, 4  ;;  %s62_s0 = int_to_ptr.hbm [resolvable:$true] %s61_s0 }
   0xb   :  { %s50_s16 = sshll.u32 %s2218_s15, 4  ;;  %s2219_s19 = smov 768   ;;  %s51_s16 = int_to_ptr.vmem [resolvable:$true] %s50_s16 }
   0xc   :  { %s2220_s20 = smov 48   ;;  %s2221_s21 = smov [#allocation8]  }
   0xd   :  { %56 = dma.hbm_to_vmem [thread:$0]  %s49_s1, 6144, %s51_s16, [#allocation6], %s2219_s19, %s2219_s19, %s2220_s20  }
   0xe   :  { %s63_s22 = sshll.u32 %s2221_s21, 4  ;;  %s64_s22 = int_to_ptr.vmem [resolvable:$true] %s63_s22 }
   0xf   :  { %69 = dma.hbm_to_vmem [thread:$0]  %s62_s0, 512, %s64_s22, [#allocation9], %s2216_s11, %s2216_s11, %s2217_s12  }
  0x10   :  { %2204 = dma.done.wait [#allocation3], 512  }
  0x11   :  { %2205 = vsyncadd [#allocation3], 4294966784 }
  0x12   :  { %2206 = dma.done.wait [#allocation6], 6160  }
  0x13   :  { %2207 = vsyncadd [#allocation6], 4294961136 }
  0x14   :  { %2208 = dma.done.wait [#allocation9], 512  }
  0x15   :  { %2209 = vsyncadd [#allocation9], 4294966784  ;;  %vm90_vm0 = vcmask 523264   ;;  %v89_v0 = vld [vmem:[#allocation2 + $0x18] sm:$0xff]  ;;  %v88_v1 = vld [vmem:[#allocation2 + $0x10] sm:$0xff]  ;;  %v2222_v8 = vmov 64.0  }
  0x16   :  { %v100_v2 = vsel %vm90_vm0, %v89_v0, 0.0  ;;  %v97_v3 = vsel %vm90_vm0, %v88_v1, 0.0  ;;  %v87_v4 = vld [vmem:[#allocation2 + $0x8] sm:$0xff]  ;;  %v86_v5 = vld [vmem:[#allocation2] sm:$0xff]  ;;  %2023 = vrcp.f32 %v2222_v8  ;;  %v244_v35 = vld [vmem:[#allocation7 + $0x150] sm:$0xff]  ;;  %s2231_s23 = smov [#allocation10]  }
  0x17   :  { %101 = vadd.xlane.f32.xlu1 %v100_v2  ;;  %98 = vadd.xlane.f32.xlu0 %v97_v3  ;;  %v94_v6 = vsel %vm90_vm0, %v87_v4, 0.0  ;;  %v91_v7 = vsel %vm90_vm0, %v86_v5, 0.0  ;;  %v245_v36 = vld [vmem:[#allocation7 + $0x158] sm:$0xff]  ;;  %v238_v37 = vld [vmem:[#allocation7 + $0x120] sm:$0xff]  ;;  %v239_v38 = vld [vmem:[#allocation7 + $0x128] sm:$0xff]  ;;  %s1883_s24 = sshll.u32 %s2231_s23, 4  ;;  %s1884_s24 = int_to_ptr.vmem [resolvable:$true] %s1883_s24 }
  0x18   :  { %1983 = vmatpush.msra.mxu2 %v244_v35  ;;  %1991 = vmatpush.msra.mxu3 %v245_v36  ;;  %v232_v39 = vld [vmem:[#allocation7 + $0xf0] sm:$0xff]  ;;  %v233_v40 = vld [vmem:[#allocation7 + $0xf8] sm:$0xff]  ;;  %v226_v41 = vld [vmem:[#allocation7 + $0xc0] sm:$0xff]  ;;  %s1885_s27 = sshll.u32 %s3245_s5, 4  ;;  %s2232_s5 = smov 256   ;;  %s1886_s27 = int_to_ptr.hbm [resolvable:$true] %s1885_s27 }
  0x19   :  { %270 = vmatpush.msra.mxu0 %v244_v35  ;;  %299 = vmatpush.msra.mxu1 %v245_v36  ;;  %v227_v42 = vld [vmem:[#allocation7 + $0xc8] sm:$0xff]  ;;  %v220_v43 = vld [vmem:[#allocation7 + $0x90] sm:$0xff]  ;;  %v221_v44 = vld [vmem:[#allocation7 + $0x98] sm:$0xff]  ;;  %s2233_s28 = smov 16   ;;  %s2234_s29 = smov [#allocation11]  }
  0x1a   :  { %1984 = vmatpush.msra.mxu2 %v238_v37  ;;  %1992 = vmatpush.msra.mxu3 %v239_v38  ;;  %v214_v45 = vld [vmem:[#allocation7 + $0x60] sm:$0xff]  ;;  %v215_v46 = vld [vmem:[#allocation7 + $0x68] sm:$0xff]  ;;  %v208_v47 = vld [vmem:[#allocation7 + $0x30] sm:$0xff]  ;;  %s1896_s30 = sshll.u32 %s2234_s29, 4  ;;  %s1898_s10 = sshll.u32 %s3246_s6, 4  ;;  %s1897_s30 = int_to_ptr.vmem [resolvable:$true] %s1896_s30  ;;  %s1899_s10 = int_to_ptr.hbm [resolvable:$true] %s1898_s10 }
  0x1b   :  { %271 = vmatpush.msra.mxu0 %v238_v37  ;;  %300 = vmatpush.msra.mxu1 %v239_v38  ;;  %v209_v48 = vld [vmem:[#allocation7 + $0x38] sm:$0xff]  ;;  %v202_v49 = vld [vmem:[#allocation7] sm:$0xff]  ;;  %v203_v50 = vld [vmem:[#allocation7 + $0x8] sm:$0xff]  ;;  %s2235_s6 = smov [#allocation13]   ;;  %s1911_s14 = sshll.u32 %s3247_s7, 4  ;;  %s1912_s14 = int_to_ptr.hbm [resolvable:$true] %s1911_s14 }
  0x1c   :  { %v2024_v9 = vpop.eup %2023  ;;  %1985 = vmatpush.msra.mxu2 %v232_v39  ;;  %1993 = vmatpush.msra.mxu3 %v233_v40  ;;  %v246_v51 = vld [vmem:[#allocation7 + $0x160] sm:$0xff]  ;;  %v247_v52 = vld [vmem:[#allocation7 + $0x168] sm:$0xff]  ;;  %v240_v55 = vld [vmem:[#allocation7 + $0x130] sm:$0xff]  ;;  %s1909_s11 = sshll.u32 %s2235_s6, 4  ;;  %s1910_s11 = int_to_ptr.vmem [resolvable:$true] %s1909_s11 }
  0x1d   :  { %v104_v10 = vmul.f32 64.0, %v2024_v9  ;;  %vm108_vm1 = vweird.f32 %v2024_v9  ;;  %272 = vmatpush.msra.mxu0 %v232_v39  ;;  %301 = vmatpush.msra.mxu1 %v233_v40  ;;  %v241_v56 = vld [vmem:[#allocation7 + $0x138] sm:$0xff]  ;;  %v234_v59 = vld [vmem:[#allocation7 + $0x100] sm:$0xff]  ;;  %v235_v60 = vld [vmem:[#allocation7 + $0x108] sm:$0xff] }
  0x1e   :  { %1986 = vmatpush.msra.mxu2 %v226_v41  ;;  %1994 = vmatpush.msra.mxu3 %v227_v42  ;;  %v228_v63 = vld [vmem:[#allocation7 + $0xd0] sm:$0xff]  ;;  %v222_v2 = vld [vmem:[#allocation7 + $0xa0] sm:$0xff]  ;;  %v223_v3 = vld [vmem:[#allocation7 + $0xa8] sm:$0xff] }
  0x1f   :  { %95 = vadd.xlane.f32.xlu1 %v94_v6  ;;  %92 = vadd.xlane.f32.xlu0 %v91_v7  ;;  %v105_v11 = vsub.f32 1.0, %v104_v10  ;;  %v216_v6 = vld [vmem:[#allocation7 + $0x70] sm:$0xff]  ;;  %v243_v10 = vld [vmem:[#allocation7 + $0x148] sm:$0xff]  ;;  %v218_v35 = vld [vmem:[#allocation7 + $0x80] sm:$0xff] }
  0x20   :  { %273 = vmatpush.msra.mxu0 %v226_v41  ;;  %302 = vmatpush.msra.mxu1 %v227_v42  ;;  %v219_v36 = vld [vmem:[#allocation7 + $0x88] sm:$0xff]  ;;  %v212_v38 = vld [vmem:[#allocation7 + $0x50] sm:$0xff]  ;;  %v213_v40 = vld [vmem:[#allocation7 + $0x58] sm:$0xff] }
  0x21   :  { %v106_v12 = vmul.f32 %v2024_v9, %v105_v11  ;;  %1987 = vmatpush.msra.mxu2 %v220_v43  ;;  %1995 = vmatpush.msra.mxu3 %v221_v44  ;;  %v236_v11 = vld [vmem:[#allocation7 + $0x110] sm:$0xff]  ;;  %v206_v42 = vld [vmem:[#allocation7 + $0x20] sm:$0xff] }
  0x22   :  { %274 = vmatpush.msra.mxu0 %v220_v43  ;;  %303 = vmatpush.msra.mxu1 %v221_v44 }
  0x23   :  { %v107_v13 = vadd.f32 %v2024_v9, %v106_v12  ;;  %1988 = vmatpush.msra.mxu2 %v214_v45  ;;  %1996 = vmatpush.msra.mxu3 %v215_v46 }
  0x24   :  { %275 = vmatpush.msra.mxu0 %v214_v45  ;;  %304 = vmatpush.msra.mxu1 %v215_v46  ;;  %v207_v45 = vld [vmem:[#allocation7 + $0x28] sm:$0xff] }
  0x25   :  { %v2292_v14 = vsel %vm108_vm1, %v2024_v9, %v107_v13  ;;  %1989 = vmatpush.msra.mxu2 %v208_v47  ;;  %1997 = vmatpush.msra.mxu3 %v209_v48  ;;  %v217_v9 = vld [vmem:[#allocation7 + $0x78] sm:$0xff] }
  0x26   :  { %276 = vmatpush.msra.mxu0 %v208_v47  ;;  %305 = vmatpush.msra.mxu1 %v209_v48 }
  0x27   :  { %1990 = vmatpush.msra.mxu2 %v202_v49  ;;  %1998 = vmatpush.msra.mxu3 %v203_v50 }
  0x28   :  { %277 = vmatpush.msra.mxu0 %v202_v49  ;;  %306 = vmatpush.msra.mxu1 %v203_v50  ;;  %v2021_v49 = vld [vmem:[#allocation5] ss:$0 sm:$0xff] }
  0x29   :  { %328 = vmatpush.msrb.mxu2 %v246_v51  ;;  %357 = vmatpush.msrb.mxu3 %v247_v52 }
  0x2b   :  { %329 = vmatpush.msrb.mxu2 %v240_v55  ;;  %358 = vmatpush.msrb.mxu3 %v241_v56 }
  0x2d   :  { %330 = vmatpush.msrb.mxu2 %v234_v59  ;;  %359 = vmatpush.msrb.mxu3 %v235_v60 }
  0x2f   :  { %331 = vmatpush.msrb.mxu2 %v228_v63 }
  0x31   :  { %332 = vmatpush.msrb.mxu2 %v222_v2 }
  0x33   :  { %333 = vmatpush.msrb.mxu2 %v216_v6 }
  0x8a   :  { %v102_v15 = vpop.xlane.xlu1 %101  ;;  %v99_v16 = vpop.xlane.xlu0 %98 }
  0x8b   :  { %v113_v17 = vmul.f32 %v2292_v14, %v102_v15  ;;  %v112_v18 = vmul.f32 %v2292_v14, %v99_v16  ;;  %v210_v15 = vld [vmem:[#allocation7 + $0x40] sm:$0xff]  ;;  %v211_v16 = vld [vmem:[#allocation7 + $0x48] sm:$0xff] }
  0x8c   :  { %334 = vmatpush.msrb.mxu2 %v210_v15 }
  0x8d   :  { %v2296_v19 = vsub.f32 %v89_v0, %v113_v17  ;;  %v2298_v20 = vsub.f32 %v88_v1, %v112_v18  ;;  %v229_v0 = vld [vmem:[#allocation7 + $0xd8] sm:$0xff]  ;;  %v248_v1 = vld [vmem:[#allocation7 + $0x170] sm:$0xff]  ;;  %v230_v18 = vld [vmem:[#allocation7 + $0xe0] sm:$0xff] }
  0x8e   :  { %360 = vmatpush.msrb.mxu3 %v229_v0  ;;  %386 = vmatpush.msrb.mxu0 %v248_v1  ;;  %v237_v17 = vld [vmem:[#allocation7 + $0x118] sm:$0xff] }
  0x8f   :  { %v120_v21 = vmul.f32 %v2298_v20, %v2298_v20  ;;  %v121_v22 = vmul.f32 %v2296_v19, %v2296_v19 }
  0x90   :  { %361 = vmatpush.msrb.mxu3 %v223_v3 }
  0x91   :  { %v128_v23 = vsel %vm90_vm0, %v120_v21, 0.0  ;;  %v131_v24 = vsel %vm90_vm0, %v121_v22, 0.0  ;;  %v204_v21 = vld [vmem:[#allocation7 + $0x10] sm:$0xff] }
  0x92   :  { %129 = vadd.xlane.f32.xlu2 %v128_v23  ;;  %v96_v25 = vpop.xlane.xlu1 %95  ;;  %132 = vadd.xlane.f32.xlu0 %v131_v24  ;;  %v93_v26 = vpop.xlane.xlu0 %92 }
  0x93   :  { %v111_v27 = vmul.f32 %v2292_v14, %v96_v25  ;;  %v110_v28 = vmul.f32 %v2292_v14, %v93_v26  ;;  %362 = vmatpush.msrb.mxu3 %v217_v9  ;;  %v205_v25 = vld [vmem:[#allocation7 + $0x18] sm:$0xff]  ;;  %v231_v26 = vld [vmem:[#allocation7 + $0xe8] sm:$0xff]  ;;  %335 = vmatpush.msrb.mxu2 %v204_v21 }
  0x95   :  { %v2308_v29 = vsub.f32 %v87_v4, %v111_v27  ;;  %v2310_v30 = vsub.f32 %v86_v5, %v110_v28  ;;  %v249_v4 = vld [vmem:[#allocation7 + $0x178] sm:$0xff]  ;;  %v242_v5 = vld [vmem:[#allocation7 + $0x140] sm:$0xff]  ;;  %363 = vmatpush.msrb.mxu3 %v211_v16 }
  0x96   :  { %415 = vmatpush.msrb.mxu1 %v249_v4  ;;  %387 = vmatpush.msrb.mxu0 %v242_v5 }
  0x97   :  { %v119_v31 = vmul.f32 %v2308_v29, %v2308_v29  ;;  %v118_v32 = vmul.f32 %v2310_v30, %v2310_v30  ;;  %364 = vmatpush.msrb.mxu3 %v205_v25 }
  0x98   :  { %416 = vmatpush.msrb.mxu1 %v243_v10  ;;  %388 = vmatpush.msrb.mxu0 %v236_v11 }
  0x99   :  { %v125_v33 = vsel %vm90_vm0, %v119_v31, 0.0  ;;  %v122_v34 = vsel %vm90_vm0, %v118_v32, 0.0  ;;  %v224_v32 = vld [vmem:[#allocation7 + $0xb0] sm:$0xff] }
  0x9a   :  { %126 = vadd.xlane.f32.xlu1 %v125_v33  ;;  %123 = vadd.xlane.f32.xlu2 %v122_v34  ;;  %v225_v33 = vld [vmem:[#allocation7 + $0xb8] sm:$0xff] }
  0x9b   :  { %417 = vmatpush.msrb.mxu1 %v237_v17  ;;  %389 = vmatpush.msrb.mxu0 %v230_v18 }
  0x9d   :  { %418 = vmatpush.msrb.mxu1 %v231_v26  ;;  %390 = vmatpush.msrb.mxu0 %v224_v32 }
  0x9f   :  { %419 = vmatpush.msrb.mxu1 %v225_v33  ;;  %391 = vmatpush.msrb.mxu0 %v218_v35 }
  0xa1   :  { %420 = vmatpush.msrb.mxu1 %v219_v36  ;;  %392 = vmatpush.msrb.mxu0 %v212_v38  ;;  %v2224_v36 = vmov 2475754826  }
  0xa3   :  { %421 = vmatpush.msrb.mxu1 %v213_v40  ;;  %393 = vmatpush.msrb.mxu0 %v206_v42  ;;  %v2226_v42 = vmov 2102212464  }
  0xa5   :  { %422 = vmatpush.msrb.mxu1 %v207_v45 }
 0x105   :  { %v130_v53 = vpop.xlane.xlu2 %129  ;;  %v133_v54 = vpop.xlane.xlu0 %132 }
 0x106   :  { %v136_v57 = vmul.f32 %v130_v53, %v2292_v14  ;;  %v137_v58 = vmul.f32 %v133_v54, %v2292_v14  ;;  %v2022_v54 = vld [vmem:[%s3242_s2] ss:$0 sm:$0xff]  ;;  %s2230_s2 = smov 64  }
 0x108   :  { %v2320_v61 = vadd.f32 1e-05, %v136_v57  ;;  %v2322_v62 = vadd.f32 1e-05, %v137_v58 }
 0x10a   :  { %2025 = vrsqrt.f32 %v2320_v61  ;;  %vm168_vm3 = vweird.f32 %v2320_v61  ;;  %vm178_vm4 = vweird.f32 %v2322_v62 }
 0x10b   :  { %2027 = vrsqrt.f32 %v2322_v62 }
 0x10d   :  { %v127_v7 = vpop.xlane.xlu1 %126  ;;  %v124_v8 = vpop.xlane.xlu2 %123 }
 0x10e   :  { %v135_v12 = vmul.f32 %v127_v7, %v2292_v14  ;;  %v134_v13 = vmul.f32 %v124_v8, %v2292_v14  ;;  %v2357_v7 = vld [vmem:[#allocation8 + $0x10] sm:$0xff]  ;;  %v2359_v8 = vld [vmem:[#allocation8] sm:$0xff] }
 0x10f   :  { %v443_v11 = vand.u32 2139095040, %v2359_v8  ;;  %v3248_v32 = vand.u32 2147483647, %v2357_v7  ;;  %v3250_v33 = vand.u32 2147483647, %v2359_v8 }
 0x110   :  { %v2026_v22 = vpop.eup %2025  ;;  %v2328_v23 = vadd.f32 1e-05, %v135_v12  ;;  %v2330_v24 = vadd.f32 1e-05, %v134_v13 }
 0x111   :  { %v2028_v27 = vpop.eup %2027  ;;  %v163_v14 = vmul.f32 %v2026_v22, %v2320_v61  ;;  %vm169_vm2 = vweird.f32 %v2026_v22  ;;  %v444_v13 = vshrl.u32 %v443_v11, 23 }
 0x112   :  { %v173_v28 = vmul.f32 %v2028_v27, %v2322_v62  ;;  %2029 = vrsqrt.f32 %v2328_v23  ;;  %vm179_vm5 = vweird.f32 %v2028_v27  ;;  %vm170_vm6 = vmor %vm168_vm3, %vm169_vm2  ;;  %vm158_vm9 = vweird.f32 %v2328_v23 }
 0x113   :  { %v164_v31 = vmul.f32 %v2026_v22, %v163_v14  ;;  %2031 = vrsqrt.f32 %v2330_v24  ;;  %vm180_vm7 = vmor %vm178_vm4, %vm179_vm5  ;;  %vm148_vm11 = vweird.f32 %v2330_v24 }
 0x114   :  { %v174_v34 = vmul.f32 %v2028_v27, %v173_v28 }
 0x115   :  { %v165_v37 = vmul.f32 0.5, %v164_v31 }
 0x116   :  { %v175_v39 = vmul.f32 0.5, %v174_v34  ;;  %v2223_v34 = vmov 683565275  }
 0x117   :  { %v166_v41 = vsub.f32 1.5, %v165_v37 }
 0x118   :  { %v2030_v43 = vpop.eup %2029  ;;  %v176_v44 = vsub.f32 1.5, %v175_v39  ;;  %v2225_v39 = vmov 2131351028  }
 0x119   :  { %v2032_v46 = vpop.eup %2031  ;;  %v167_v47 = vmul.f32 %v2026_v22, %v166_v41  ;;  %v153_v48 = vmul.f32 %v2030_v43, %v2328_v23  ;;  %vm159_vm10 = vweird.f32 %v2030_v43 }
 0x11a   :  { %v177_v50 = vmul.f32 %v2028_v27, %v176_v44  ;;  %v143_v51 = vmul.f32 %v2032_v46, %v2330_v24  ;;  %vm149_vm8 = vweird.f32 %v2032_v46  ;;  %vm160_vm13 = vmor %vm158_vm9, %vm159_vm10  ;;  %v2378_v24 = vld [vmem:[#allocation8 + $0x18] sm:$0xff] }
 0x11b   :  { %v171_v52 = vsel %vm170_vm6, %v2026_v22, %v167_v47  ;;  %v154_v53 = vmul.f32 %v2030_v43, %v153_v48  ;;  %vm150_vm12 = vmor %vm148_vm11, %vm149_vm8  ;;  %v2417_v47 = vand.u32 8388607, %v3248_v32 }
 0x11c   :  { %v184_v55 = vmul.f32 %v171_v52, %v2298_v20  ;;  %v144_v56 = vmul.f32 %v2032_v46, %v143_v51  ;;  %v181_v57 = vsel %vm180_vm7, %v2028_v27, %v177_v50  ;;  %v905_v27 = vand.u32 2139095040, %v2378_v24 }
 0x11d   :  { %v155_v58 = vmul.f32 0.5, %v154_v53  ;;  %v185_v63 = vmul.f32 %v181_v57, %v2296_v19  ;;  %v447_v50 = vand.u32 8388607, %v3250_v33  ;;  %v2227_v57 = vmov 920167782  }
 0x11e   :  { %v192_v59 = vmul.f32 %v2021_v49, %v184_v55  ;;  %v145_v60 = vmul.f32 0.5, %v144_v56  ;;  %v906_v31 = vshrl.u32 %v905_v27, 23 }
 0x11f   :  { %v156_v61 = vsub.f32 1.5, %v155_v58  ;;  %v193_v20 = vmul.f32 %v2021_v49, %v185_v63 }
 0x120   :  { %v2345_v62 = vadd.f32 %v2022_v54, %v192_v59  ;;  %v146_v0 = vsub.f32 1.5, %v145_v60  ;;  %v2402_v44 = vadd.s32 4294967169, %v906_v31 }
 0x121   :  { %v157_v1 = vmul.f32 %v2030_v43, %v156_v61  ;;  %v2355_v6 = vadd.f32 %v2022_v54, %v193_v20 }
 0x122   :  { %v147_v2 = vmul.f32 %v2032_v46, %v146_v0  ;;  %1937 = vmatmul.msk.f32.vlgmr.msra.gmra.mxu2 %vm90_vm0, %v2345_v62  ;;  %1941 = vmatmul.msk.f32.vlgmr.msra.gmra.mxu3 %vm90_vm0, %v2345_v62  ;;  %v448_v0 = vor.u32 8388608, %v447_v50 }
 0x123   :  { %v161_v4 = vsel %vm160_vm13, %v2030_v43, %v157_v1 }
 0x124   :  { %v151_v3 = vsel %vm150_vm12, %v2032_v46, %v147_v2  ;;  %v183_v9 = vmul.f32 %v161_v4, %v2308_v29  ;;  %v1959_v29 = vadd.s32 4294967169, %v444_v13  ;;  %v756_v2 = vor.u32 8388608, %v2417_v47 }
 0x125   :  { %v182_v19 = vmul.f32 %v151_v3, %v2310_v30  ;;  %v751_v30 = vand.u32 2139095040, %v2357_v7  ;;  %v3249_v47 = vand.u32 2147483647, %v2378_v24 }
 0x126   :  { %v191_v12 = vmul.f32 %v2021_v49, %v183_v9  ;;  %v450_v18 = vadd.s32 1, %v1959_v29  ;;  %v2474_v29 = vshll.u32 %v448_v0, 8 }
 0x127   :  { %v190_v5 = vmul.f32 %v2021_v49, %v182_v19  ;;  %v752_v15 = vshrl.u32 %v751_v30, 23 }
 0x128   :  { %v199_v16 = vadd.f32 %v2022_v54, %v191_v12  ;;  %vm451_vm14 = vcmp.gt.s32.totalorder %v450_v18, 0 }
 0x129   :  { %v198_v10 = vadd.f32 %v2022_v54, %v190_v5  ;;  %v1965_v17 = vadd.s32 4294967169, %v752_v15  ;;  %v452_v22 = vsel %vm451_vm14, %v450_v18, 0 }
 0x12a   :  { %1938 = vmatmul.msk.f32.gmra.mxu2 %vm90_vm0, %v2355_v6  ;;  %1942 = vmatmul.msk.f32.gmra.mxu3 %vm90_vm0, %v2355_v6  ;;  %v454_v25 = vand.u32 31, %v452_v22  ;;  %v2409_v46 = vshrl.u32 %v452_v22, 5 }
 0x12b   :  { %1935 = vmatmul.msk.f32.vlgmr.msra.gmra.mxu0 %vm90_vm0, %v198_v10  ;;  %1939 = vmatmul.msk.f32.vlgmr.msra.gmra.mxu1 %vm90_vm0, %v198_v10  ;;  %v758_v21 = vadd.s32 1, %v1965_v17 }
 0x12c   :  { %v2387_v14 = vsub.s32 32, %v454_v25  ;;  %v457_v35 = vshll.u32 %v2223_v34, %v454_v25  ;;  %v460_v38 = vshll.u32 %v2224_v36, %v454_v25  ;;  %v463_v41 = vshll.u32 %v2225_v39, %v454_v25 }
 0x12d   :  { %vm759_vm15 = vcmp.gt.s32.totalorder %v758_v21, 0  ;;  %v466_v56 = vshll.u32 %v2226_v42, %v454_v25  ;;  %v469_v59 = vshll.u32 %v2227_v57, %v454_v25  ;;  %vm472_vm1 = vcmp.lt.s32.totalorder %v2409_v46, 1 }
 0x12e   :  { %v760_v23 = vsel %vm759_vm15, %v758_v21, 0  ;;  %v458_v37 = vshrl.u32 %v2224_v36, %v2387_v14  ;;  %v461_v40 = vshrl.u32 %v2225_v39, %v2387_v14  ;;  %v464_v43 = vshrl.u32 %v2226_v42, %v2387_v14 }
 0x12f   :  { %v762_v26 = vand.u32 31, %v760_v23  ;;  %v2419_v48 = vshrl.u32 %v760_v23, 5  ;;  %v467_v58 = vshrl.u32 %v2227_v57, %v2387_v14  ;;  %vm474_vm2 = vcmp.lt.s32.totalorder %v2409_v46, 3 }
 0x130   :  { %v459_v53 = vor.u32 %v458_v37, %v457_v35  ;;  %v2427_v54 = vor.u32 %v461_v40, %v460_v38  ;;  %v465_v55 = vor.u32 %v464_v43, %v463_v41  ;;  %vm475_vm3 = vcmp.lt.s32.totalorder %v2409_v46, 4 }
 0x131   :  { %v2389_v28 = vsub.s32 32, %v762_v26  ;;  %v774_v45 = vshll.u32 %v2226_v42, %v762_v26  ;;  %v765_v49 = vshll.u32 %v2223_v34, %v762_v26  ;;  %v768_v52 = vshll.u32 %v2224_v36, %v762_v26 }
 0x132   :  { %1943 = vmatmul.msk.f32.vlgmr.msrb.gmra.mxu2 %vm90_vm0, %v198_v10  ;;  %1947 = vmatmul.msk.f32.vlgmr.msrb.gmra.mxu3 %vm90_vm0, %v198_v10  ;;  %v771_v61 = vshll.u32 %v2225_v39, %v762_v26  ;;  %v468_v1 = vor.u32 %v467_v58, %v466_v56  ;;  %vm473_vm4 = vcmp.lt.s32.totalorder %v2409_v46, 2  ;;  %v480_v4 = vsel %vm472_vm1, %v459_v53, %v2427_v54 }
 0x133   :  { %1936 = vmatmul.msk.f32.gmra.mxu0 %vm90_vm0, %v199_v16  ;;  %1940 = vmatmul.msk.f32.gmra.mxu1 %vm90_vm0, %v199_v16  ;;  %v766_v51 = vshrl.u32 %v2224_v36, %v2389_v28  ;;  %v769_v60 = vshrl.u32 %v2225_v39, %v2389_v28  ;;  %v772_v20 = vshrl.u32 %v2226_v42, %v2389_v28  ;;  %v490_v25 = vshrl.u32 %v2474_v29, 16 }
 0x134   :  { %v775_v19 = vshrl.u32 %v2227_v57, %v2389_v28  ;;  %v481_v5 = vsel %vm475_vm3, %v468_v1, 920167782  ;;  %v484_v9 = vsel %vm472_vm1, %v2427_v54, %v465_v55  ;;  %v2458_v11 = vshll.u32 %v2227_v57, %v762_v26 }
 0x135   :  { %v482_v30 = vsel %vm474_vm2, %v465_v55, %v481_v5  ;;  %v2468_v13 = vor.u32 %v769_v60, %v768_v52  ;;  %v2484_v27 = vor.u32 %v772_v20, %v771_v61  ;;  %vm783_vm5 = vcmp.lt.s32.totalorder %v2419_v48, 4 }
 0x136   :  { %v483_v15 = vsel %vm473_vm4, %v480_v4, %v482_v30  ;;  %v2480_v23 = vor.u32 %v775_v19, %v774_v45  ;;  %vm782_vm6 = vcmp.lt.s32.totalorder %v2419_v48, 3  ;;  %v456_v35 = vshrl.u32 %v2223_v34, %v2387_v14 }
 0x137   :  { %v513_v21 = vand.u32 65535, %v483_v15  ;;  %v514_v22 = vshrl.u32 %v483_v15, 16  ;;  %v477_v60 = vsel %vm475_vm3, %v465_v55, 2102212464  ;;  %vm781_vm12 = vcmp.lt.s32.totalorder %v2419_v48, 2 }
 0x138   :  { %v789_v50 = vsel %vm783_vm5, %v2480_v23, 920167782  ;;  %v478_v55 = vsel %vm474_vm2, %v2427_v54, %v477_v60 }
 0x139   :  { %v517_v45 = vmul.u32 %v513_v21, %v490_v25  ;;  %v518_v58 = vmul.u32 %v514_v22, %v490_v25  ;;  %v790_v54 = vsel %vm782_vm6, %v2484_v27, %v789_v50 }
 0x13a   :  { %1944 = vmatmul.msk.f32.gmra.mxu2 %vm90_vm0, %v199_v16  ;;  %1948 = vmatmul.msk.f32.gmra.mxu3 %vm90_vm0, %v199_v16 }
 0x13b   :  { %1951 = vmatmul.msk.f32.vlgmr.msrb.gmra.mxu0 %vm90_vm0, %v198_v10  ;;  %1955 = vmatmul.msk.f32.vlgmr.msrb.gmra.mxu1 %vm90_vm0, %v198_v10  ;;  %v2455_v10 = vor.u32 %v766_v51, %v765_v49  ;;  %v521_v61 = vshll.u32 %v517_v45, 16  ;;  %v522_v15 = vshrl.u32 %v517_v45, 16 }
 0x142   :  { %1945 = vmatmul.msk.f32.gmra.mxu2 %vm90_vm0, %v2345_v62  ;;  %1949 = vmatmul.msk.f32.gmra.mxu3 %vm90_vm0, %v2345_v62 }
 0x143   :  { %1952 = vmatmul.msk.f32.gmra.mxu0 %vm90_vm0, %v199_v16  ;;  %1956 = vmatmul.msk.f32.gmra.mxu1 %vm90_vm0, %v199_v16 }
 0x14a   :  { %1946 = vmatmul.msk.f32.gmra.mxu2 %vm90_vm0, %v2355_v6  ;;  %1950 = vmatmul.msk.f32.gmra.mxu3 %vm90_vm0, %v2355_v6 }
 0x14b   :  { %1953 = vmatmul.msk.f32.gmra.mxu0 %vm90_vm0, %v2345_v62  ;;  %1957 = vmatmul.msk.f32.gmra.mxu1 %vm90_vm0, %v2345_v62  ;;  %v2228_v62 = vmov 1326507024  }
 0x14c   :  { %v470_v63 = vshrl.u32 %v2228_v62, %v2387_v14  ;;  %v778_v17 = vshrl.u32 %v2228_v62, %v2389_v28  ;;  %v476_v14 = vsel %vm472_vm1, %v456_v35, %v459_v53  ;;  %v2523_v35 = vshll.u32 %v756_v2, 8 }
 0x14e   :  { %v471_v3 = vor.u32 %v470_v63, %v469_v59  ;;  %v779_v49 = vor.u32 %v778_v17, %v2458_v11  ;;  %v912_v63 = vadd.s32 1, %v2402_v44  ;;  %v797_v50 = vand.u32 65535, %v2523_v35 }
 0x150   :  { %v485_v12 = vsel %vm475_vm3, %v471_v3, 1326507024  ;;  %v2229_v3 = vmov 0   ;;  %vm913_vm11 = vcmp.gt.s32.totalorder %v912_v63, 0 }
 0x151   :  { %v486_v16 = vsel %vm474_vm2, %v468_v1, %v485_v12 }
 0x152   :  { %v487_v18 = vsel %vm473_vm4, %v484_v9, %v486_v16 }
 0x153   :  { %1954 = vmatmul.msk.f32.gmra.mxu0 %vm90_vm0, %v2355_v6  ;;  %1958 = vmatmul.msk.f32.gmra.mxu1 %vm90_vm0, %v2355_v6  ;;  %v489_v6 = vand.u32 65535, %v2474_v29  ;;  %v491_v26 = vand.u32 65535, %v487_v18  ;;  %vm780_vm0 = vcmp.lt.s32.totalorder %v2419_v48, 1  ;;  %v492_v31 = vshrl.u32 %v487_v18, 16 }
 0x154   :  { %v788_v17 = vsel %vm780_vm0, %v2455_v10, %v2468_v13  ;;  %v914_v18 = vsel %vm913_vm11, %v912_v63, 0  ;;  %v792_v46 = vsel %vm780_vm0, %v2468_v13, %v2484_v27 }
 0x155   :  { %v493_v37 = vmul.u32 %v491_v26, %v489_v6  ;;  %v495_v38 = vmul.u32 %v491_v26, %v490_v25  ;;  %v494_v40 = vmul.u32 %v492_v31, %v489_v6  ;;  %v515_v41 = vmul.u32 %v513_v21, %v489_v6 }
 0x156   :  { %v516_v43 = vmul.u32 %v514_v22, %v489_v6  ;;  %v496_v51 = vmul.u32 %v492_v31, %v490_v25  ;;  %v793_v21 = vsel %vm783_vm5, %v779_v49, 1326507024  ;;  %v479_v25 = vsel %vm473_vm4, %v476_v14, %v478_v55 }
 0x157   :  { %v497_v52 = vshll.u32 %v494_v40, 16  ;;  %v499_v56 = vshll.u32 %v495_v38, 16  ;;  %v498_v20 = vshrl.u32 %v494_v40, 16  ;;  %v500_v44 = vshrl.u32 %v495_v38, 16 }
 0x158   :  { %v519_v59 = vshll.u32 %v516_v43, 16  ;;  %v520_v4 = vshrl.u32 %v516_v43, 16  ;;  %v916_v31 = vand.u32 31, %v914_v18  ;;  %v2529_v40 = vsel %vm781_vm12, %v788_v17, %v790_v54 }
 0x159   :  { %vm501_vm7 = vc.u32 %v493_v37, %v497_v52  ;;  %v503_v0 = vadd.s32 %v497_v52, %v493_v37  ;;  %v533_v2 = vmul.u32 %v2474_v29, %v479_v25 }
 0x15a   :  { %vm523_vm8 = vc.u32 %v515_v41, %v519_v59  ;;  %v525_v1 = vadd.s32 %v519_v59, %v515_v41  ;;  %v502_v19 = vsel %vm501_vm7, 1, %v2229_v3  ;;  %v794_v41 = vsel %vm782_vm6, %v2480_v23, %v793_v21 }
 0x15b   :  { %v524_v5 = vsel %vm523_vm8, 1, %v2229_v3  ;;  %v504_v9 = vadd.s32 %v502_v19, %v496_v51  ;;  %vm505_vm9 = vc.u32 %v503_v0, %v499_v56  ;;  %v2540_v43 = vsub.s32 32, %v916_v31 }
 0x15c   :  { %v526_v53 = vadd.s32 %v524_v5, %v518_v58  ;;  %vm527_vm10 = vc.u32 %v525_v1, %v521_v61  ;;  %v506_v11 = vsel %vm505_vm9, 1, %v2229_v3  ;;  %v2519_v26 = vadd.s32 %v525_v1, %v521_v61 }
 0x15d   :  { %v528_v30 = vsel %vm527_vm10, 1, %v2229_v3  ;;  %v508_v12 = vadd.s32 %v506_v11, %v504_v9  ;;  %v2546_v49 = vsel %vm781_vm12, %v792_v46, %v794_v41  ;;  %v822_v51 = vshrl.u32 %v2529_v40, 16 }
 0x15e   :  { %v530_v16 = vadd.s32 %v528_v30, %v526_v53  ;;  %v909_v23 = vand.u32 8388607, %v3249_v47  ;;  %v2552_v56 = vshrl.u32 %v914_v18, 5  ;;  %v922_v29 = vshll.u32 %v2224_v36, %v916_v31 }
 0x15f   :  { %v509_v22 = vadd.s32 %v508_v12, %v498_v20  ;;  %v923_v59 = vshrl.u32 %v2225_v39, %v2540_v43  ;;  %v925_v14 = vshll.u32 %v2225_v39, %v916_v31  ;;  %v926_v60 = vshrl.u32 %v2226_v42, %v2540_v43 }
 0x160   :  { %v531_v6 = vadd.s32 %v530_v16, %v520_v4  ;;  %v928_v61 = vshll.u32 %v2226_v42, %v916_v31  ;;  %v929_v63 = vshrl.u32 %v2227_v57, %v2540_v43  ;;  %v931_v0 = vshll.u32 %v2227_v57, %v916_v31 }
 0x161   :  { %v2525_v37 = vadd.s32 %v509_v22, %v500_v44  ;;  %v932_v1 = vshrl.u32 %v2228_v62, %v2540_v43  ;;  %v800_v20 = vshrl.u32 %v2546_v49, 16  ;;  %v821_v19 = vand.u32 65535, %v2529_v40 }
 0x162   :  { %v532_v38 = vadd.s32 %v531_v6, %v522_v15  ;;  %v798_v5 = vshrl.u32 %v2523_v35, 16  ;;  %v910_v9 = vor.u32 8388608, %v909_v23  ;;  %v919_v53 = vshll.u32 %v2223_v34, %v916_v31 }
 0x163   :  { %vm535_vm13 = vc.u32 %v2525_v37, %v2519_v26  ;;  %v920_v55 = vshrl.u32 %v2224_v36, %v2540_v43  ;;  %v799_v44 = vand.u32 65535, %v2546_v49  ;;  %v2575_v30 = vor.u32 %v923_v59, %v922_v29 }
 0x164   :  { %v536_v45 = vadd.s32 1, %v532_v38  ;;  %v2577_v12 = vor.u32 %v926_v60, %v925_v14  ;;  %v2579_v15 = vmul.u32 %v822_v51, %v797_v50  ;;  %v930_v16 = vor.u32 %v929_v63, %v928_v61 }
 0x165   :  { %v933_v17 = vor.u32 %v932_v1, %v931_v0  ;;  %vm934_vm14 = vcmp.lt.s32.totalorder %v2552_v56, 1  ;;  %v2582_v18 = vmul.u32 %v800_v20, %v797_v50  ;;  %v823_v54 = vmul.u32 %v821_v19, %v797_v50 }
 0x166   :  { %v537_v52 = vsel %vm535_vm13, %v536_v45, %v532_v38  ;;  %vm937_vm15 = vcmp.lt.s32.totalorder %v2552_v56, 4  ;;  %v2586_v22 = vmul.u32 %v821_v19, %v798_v5  ;;  %v2588_v6 = vor.u32 %v920_v55, %v919_v53 }
 0x167   :  { %v538_v58 = vadd.s32 %v537_v52, %v533_v2  ;;  %vm936_vm1 = vcmp.lt.s32.totalorder %v2552_v56, 3  ;;  %v2591_v25 = vshll.u32 %v910_v9, 8  ;;  %v801_v31 = vmul.u32 %v799_v44, %v797_v50 }
 0x168   :  { %vm935_vm2 = vcmp.lt.s32.totalorder %v2552_v56, 2  ;;  %v946_v40 = vsel %vm934_vm14, %v2575_v30, %v2577_v12  ;;  %v2600_v46 = vmul.u32 %v799_v44, %v798_v5  ;;  %v827_v41 = vshll.u32 %v2579_v15, 16 }
 0x169   :  { %v539_v4 = vadd.s32 536870912, %v538_v58  ;;  %v943_v2 = vsel %vm937_vm15, %v930_v16, 920167782  ;;  %v947_v45 = vsel %vm937_vm15, %v933_v17, 1326507024  ;;  %v805_v49 = vshll.u32 %v2582_v18, 16 }
 0x16a   :  { %v948_v52 = vsel %vm936_vm1, %v930_v16, %v947_v45  ;;  %v942_v23 = vsel %vm934_vm14, %v2588_v6, %v2575_v30  ;;  %v944_v14 = vsel %vm936_vm1, %v2577_v12, %v943_v2  ;;  %v829_v63 = vshll.u32 %v2586_v22, 16 }
 0x16b   :  { %v2573_v11 = vshrl.u32 %v539_v4, 30  ;;  %v949_v29 = vsel %vm935_vm2, %v946_v40, %v948_v52  ;;  %vm831_vm4 = vc.u32 %v823_v54, %v827_v41  ;;  %v2624_v0 = vadd.s32 %v827_v41, %v823_v54 }
 0x16c   :  { %v953_v60 = vand.u32 65535, %v949_v29  ;;  %v954_v61 = vshrl.u32 %v949_v29, 16  ;;  %v807_v19 = vshll.u32 %v2600_v46, 16  ;;  %vm809_vm7 = vc.u32 %v801_v31, %v805_v49 }
 0x16d   :  { %v541_v21 = vshll.u32 %v2573_v11, 30  ;;  %v811_v4 = vadd.s32 %v805_v49, %v801_v31  ;;  %v826_v9 = vmul.u32 %v822_v51, %v798_v5  ;;  %v945_v55 = vsel %vm935_vm2, %v942_v23, %v944_v14  ;;  %v2640_v49 = vld [vmem:[#allocation8 + $0x8] sm:$0xff] }
 0x16e   :  { %v952_v44 = vshrl.u32 %v2591_v25, 16  ;;  %v804_v17 = vmul.u32 %v800_v20, %v798_v5  ;;  %v810_v54 = vsel %vm809_vm7, 1, %v2229_v3  ;;  %vm835_vm8 = vc.u32 %v2624_v0, %v829_v63 }
 0x16f   :  { %v2593_v38 = vsub.s32 %v538_v58, %v541_v21  ;;  %v951_v58 = vand.u32 65535, %v2591_v25  ;;  %v832_v21 = vsel %vm831_vm4, 1, %v2229_v3  ;;  %vm813_vm10 = vc.u32 %v811_v4, %v807_v19 }
 0x170   :  { %v976_v41 = vshrl.u32 %v945_v55, 16  ;;  %v834_v2 = vadd.s32 %v832_v21, %v826_v9  ;;  %v2638_v45 = vmul.u32 %v953_v60, %v952_v44  ;;  %v812_v20 = vadd.s32 %v810_v54, %v804_v17 }
 0x171   :  { %vm543_vm3 = vcmp.lt.s32.totalorder %v2593_v38, 0  ;;  %v544_v50 = vsub.s32 0, %v2593_v38  ;;  %v2630_v16 = vmul.u32 %v954_v61, %v951_v58  ;;  %v955_v40 = vmul.u32 %v953_v60, %v951_v58 }
 0x172   :  { %v828_v5 = vshrl.u32 %v2579_v15, 16  ;;  %v806_v52 = vshrl.u32 %v2582_v18, 16  ;;  %v814_v23 = vsel %vm813_vm10, 1, %v2229_v3  ;;  %v764_v14 = vshrl.u32 %v2223_v34, %v2389_v28 }
 0x173   :  { %v545_v59 = vsel %vm543_vm3, %v544_v50, %v2593_v38  ;;  %v959_v51 = vshll.u32 %v2630_v16, 16  ;;  %v836_v50 = vsel %vm835_vm8, 1, %v2229_v3  ;;  %v978_v60 = vmul.u32 %v976_v41, %v951_v58 }
 0x174   :  { %v546_v1 = vclz %v545_v59  ;;  %v975_v59 = vand.u32 65535, %v945_v55  ;;  %v597_v19 = vand.u32 2139095040, %v2640_v49  ;;  %v838_v4 = vadd.s32 %v836_v50, %v834_v2 }
 0x175   :  { %vm963_vm11 = vc.u32 %v955_v40, %v959_v51  ;;  %v961_v9 = vshll.u32 %v2638_v45, 16  ;;  %v785_v18 = vsel %vm783_vm5, %v2484_v27, 2102212464  ;;  %v808_v17 = vshrl.u32 %v2600_v46, 16 }
 0x176   :  { %v1960_v53 = vadd.s32 4294967294, %v546_v1  ;;  %v958_v1 = vmul.u32 %v954_v61, %v952_v44  ;;  %v964_v15 = vsel %vm963_vm11, 1, %v2229_v3  ;;  %v816_v55 = vadd.s32 %v814_v23, %v812_v20 }
 0x177   :  { %v830_v21 = vshrl.u32 %v2586_v22, 16  ;;  %v534_v28 = vadd.s32 %v2519_v26, %v2525_v37  ;;  %v979_v2 = vmul.u32 %v975_v59, %v952_v44  ;;  %v977_v32 = vmul.u32 %v975_v59, %v951_v58 }
 0x178   :  { %vm1961_vm9 = vcmp.lt.s32.totalorder %v1960_v53, 0  ;;  %v966_v50 = vadd.s32 %v964_v15, %v958_v1  ;;  %v981_v47 = vshll.u32 %v978_v60, 16  ;;  %v598_v33 = vshrl.u32 %v597_v19, 23 }
 0x179   :  { %v549_v31 = vsel %vm1961_vm9, 0, %v1960_v53  ;;  %v965_v53 = vadd.s32 %v959_v51, %v955_v40  ;;  %v784_v40 = vsel %vm780_vm0, %v764_v14, %v2455_v10  ;;  %v839_v27 = vadd.s32 %v838_v4, %v828_v5 }
 0x17a   :  { %v554_v29 = vsub.s32 4294967266, %v549_v31  ;;  %v550_v61 = vsub.s32 32, %v549_v31  ;;  %v918_v46 = vshrl.u32 %v2223_v34, %v2540_v43  ;;  %v551_v51 = vshll.u32 %v2593_v38, %v549_v31 }
 0x17b   :  { %vm967_vm5 = vc.u32 %v965_v53, %v961_v9  ;;  %v939_v26 = vsel %vm937_vm15, %v2577_v12, 2102212464  ;;  %v960_v37 = vshrl.u32 %v2630_v16, 16  ;;  %v980_v58 = vmul.u32 %v976_v41, %v952_v44 }
 0x17c   :  { %v555_v54 = vadd.s32 127, %v554_v29  ;;  %v552_v20 = vshrl.u32 %v534_v28, %v550_v61  ;;  %v968_v29 = vsel %vm967_vm5, 1, %v2229_v3  ;;  %v983_v59 = vshll.u32 %v979_v2, 16 }
 0x17d   :  { %v817_v10 = vadd.s32 %v816_v55, %v806_v52  ;;  %v970_v5 = vadd.s32 %v968_v29, %v966_v50  ;;  %vm985_vm0 = vc.u32 %v977_v32, %v981_v47  ;;  %v1962_v14 = vadd.s32 4294967169, %v598_v33 }
 0x17e   :  { %v556_v23 = vshll.u32 %v555_v54, 23  ;;  %v840_v43 = vadd.s32 %v839_v27, %v830_v21  ;;  %v938_v38 = vsel %vm934_vm14, %v918_v46, %v2588_v6  ;;  %v986_v31 = vsel %vm985_vm0, 1, %v2229_v3 }
 0x17f   :  { %v987_v12 = vadd.s32 %v981_v47, %v977_v32  ;;  %v940_v44 = vsel %vm936_vm1, %v2575_v30, %v939_v26  ;;  %v962_v16 = vshrl.u32 %v2638_v45, 16  ;;  %v971_v41 = vadd.s32 %v970_v5, %v960_v37 }
 0x180   :  { %v988_v1 = vadd.s32 %v986_v31, %v980_v58  ;;  %v553_v52 = vor.u32 %v552_v20, %v551_v51  ;;  %v557_v19 = vor.u32 4788187, %v556_v23  ;;  %v982_v4 = vshrl.u32 %v978_v60, 16 }
 0x181   :  { %vm989_vm13 = vc.u32 %v987_v12, %v983_v59  ;;  %v2677_v33 = vadd.s32 %v817_v10, %v808_v17  ;;  %v2682_v6 = vadd.s32 %v2624_v0, %v829_v63  ;;  %v604_v47 = vadd.s32 1, %v1962_v14 }
 0x182   :  { %v990_v32 = vsel %vm989_vm13, 1, %v2229_v3  ;;  %v786_v30 = vsel %vm782_vm6, %v2468_v13, %v785_v18  ;;  %v844_v45 = vadd.s32 1, %v840_v43  ;;  %v984_v9 = vshrl.u32 %v979_v2, 16 }
 0x183   :  { %v992_v15 = vadd.s32 %v990_v32, %v988_v1  ;;  %v941_v60 = vsel %vm935_vm2, %v938_v38, %v940_v44  ;;  %v2690_v53 = vadd.s32 %v971_v41, %v962_v16  ;;  %v2692_v17 = vadd.s32 %v987_v12, %v983_v59 }
 0x184   :  { %vm605_vm14 = vcmp.gt.s32.totalorder %v604_v47, 0  ;;  %v558_v22 = vand.u32 2147483647, %v557_v19  ;;  %v560_v63 = vcvt.s32.f32 %v553_v52  ;;  %v787_v21 = vsel %vm781_vm12, %v784_v40, %v786_v30 }
 0x185   :  { %v993_v0 = vadd.s32 %v992_v15, %v982_v4  ;;  %v606_v55 = vsel %vm605_vm14, %v604_v47, 0  ;;  %vm843_vm6 = vc.u32 %v2677_v33, %v2682_v6  ;;  %v594_v13 = vand.u32 2147483647, %v2640_v49 }
 0x186   :  { %v608_v18 = vand.u32 31, %v606_v55  ;;  %v995_v28 = vmul.u32 %v2591_v25, %v941_v60  ;;  %vm997_vm15 = vc.u32 %v2690_v53, %v2692_v17  ;;  %v841_v54 = vmul.u32 %v2523_v35, %v787_v21 }
 0x187   :  { %v994_v56 = vadd.s32 %v993_v0, %v984_v9  ;;  %v845_v2 = vsel %vm843_vm6, %v844_v45, %v840_v43  ;;  %v561_v50 = vmul.f32 %v560_v63, %v558_v22  ;;  %v601_v40 = vand.u32 8388607, %v594_v13 }
 0x188   :  { %v2702_v61 = vsub.s32 32, %v608_v18  ;;  %v2707_v27 = vshrl.u32 %v606_v55, 5  ;;  %v611_v46 = vshll.u32 %v2223_v34, %v608_v18  ;;  %v614_v51 = vshll.u32 %v2224_v36, %v608_v18 }
 0x189   :  { %v998_v48 = vadd.s32 1, %v994_v56  ;;  %v620_v37 = vshll.u32 %v2226_v42, %v608_v18  ;;  %v617_v23 = vshll.u32 %v2225_v39, %v608_v18  ;;  %v846_v59 = vadd.s32 %v845_v2, %v841_v54 }
 0x18a   :  { %v612_v26 = vshrl.u32 %v2224_v36, %v2702_v61  ;;  %v621_v35 = vshrl.u32 %v2227_v57, %v2702_v61  ;;  %v615_v20 = vshrl.u32 %v2225_v39, %v2702_v61  ;;  %v618_v29 = vshrl.u32 %v2226_v42, %v2702_v61 }
 0x18b   :  { %v999_v25 = vsel %vm997_vm15, %v998_v48, %v994_v56  ;;  %v623_v10 = vshll.u32 %v2227_v57, %v608_v18  ;;  %v562_v5 = vxor.u32 2147483648, %v561_v50  ;;  %v624_v36 = vshrl.u32 %v2228_v62, %v2702_v61 }
 0x18c   :  { %v1000_v58 = vadd.s32 %v999_v25, %v995_v28  ;;  %vm442_vm12 = vcmp.lt.s32.totalorder %v2359_v8, 0  ;;  %v602_v43 = vor.u32 8388608, %v601_v40  ;;  %v2725_v38 = vor.u32 %v612_v26, %v611_v46 }
 0x18d   :  { %v622_v31 = vor.u32 %v621_v35, %v620_v37  ;;  %v2729_v39 = vor.u32 %v615_v20, %v614_v51  ;;  %v2731_v44 = vor.u32 %v618_v29, %v617_v23  ;;  %vm629_vm1 = vcmp.lt.s32.totalorder %v2707_v27, 4 }
 0x18e   :  { %v1001_v14 = vadd.s32 536870912, %v1000_v58  ;;  %v847_v42 = vadd.s32 536870912, %v846_v59  ;;  %v625_v57 = vor.u32 %v624_v36, %v623_v10  ;;  %vm626_vm2 = vcmp.lt.s32.totalorder %v2707_v27, 1 }
 0x18f   :  { %vm628_vm3 = vcmp.lt.s32.totalorder %v2707_v27, 3  ;;  %v3251_v62 = vand.u32 2147483647, %v2359_v8  ;;  %v563_v41 = vsel %vm442_vm12, %v562_v5, %v561_v50  ;;  %vm627_vm7 = vcmp.lt.s32.totalorder %v2707_v27, 2 }
 0x190   :  { %v2727_v12 = vshrl.u32 %v1001_v14, 30  ;;  %v635_v52 = vsel %vm629_vm1, %v622_v31, 920167782  ;;  %v2748_v19 = vshll.u32 %v602_v43, 8  ;;  %v634_v32 = vsel %vm626_vm2, %v2725_v38, %v2729_v39 }
 0x191   :  { %vm2738_vm4 = vcmp.le.f32.partialorder %v3251_v62, 0.7853982  ;;  %v636_v47 = vsel %vm628_vm3, %v2731_v44, %v635_v52  ;;  %v638_v30 = vsel %vm626_vm2, %v2729_v39, %v2731_v44  ;;  %v2761_v45 = vshrl.u32 %v847_v42, 30 }
 0x192   :  { %v1003_v1 = vshll.u32 %v2727_v12, 30  ;;  %v2766_v9 = vsel %vm2738_vm4, %v2359_v8, %v563_v41  ;;  %v639_v15 = vsel %vm629_vm1, %v625_v57, 1326507024  ;;  %v637_v63 = vsel %vm627_vm7, %v634_v32, %v636_v47 }
 0x193   :  { %v640_v22 = vsel %vm628_vm3, %v622_v31, %v639_v15  ;;  %v643_v55 = vand.u32 65535, %v2748_v19  ;;  %v644_v21 = vshrl.u32 %v2748_v19, 16  ;;  %v2780_v18 = vmul.f32 %v2766_v9, %v2766_v9 }
 0x194   :  { %v1004_v4 = vsub.s32 %v1000_v58, %v1003_v1  ;;  %v641_v0 = vsel %vm627_vm7, %v638_v30, %v640_v22  ;;  %v849_v2 = vshll.u32 %v2761_v45, 30  ;;  %v667_v46 = vand.u32 65535, %v637_v63 }
 0x195   :  { %v645_v28 = vand.u32 65535, %v641_v0  ;;  %v646_v54 = vshrl.u32 %v641_v0, 16  ;;  %v668_v51 = vshrl.u32 %v637_v63, 16  ;;  %v576_v58 = vmul.f32 -0.00019511016, %v2780_v18 }
 0x196   :  { %vm1005_vm8 = vcmp.lt.s32.totalorder %v1004_v4, 0  ;;  %v1006_v60 = vsub.s32 0, %v1004_v4  ;;  %v2792_v23 = vsub.s32 %v846_v59, %v849_v2  ;;  %v996_v29 = vadd.s32 %v2692_v17, %v2690_v53 }
 0x197   :  { %v647_v48 = vmul.u32 %v645_v28, %v643_v55  ;;  %v648_v40 = vmul.u32 %v646_v54, %v643_v55  ;;  %v649_v35 = vmul.u32 %v645_v28, %v644_v21  ;;  %v650_v10 = vmul.u32 %v646_v54, %v644_v21 }
 0x198   :  { %v1007_v56 = vsel %vm1005_vm8, %v1006_v60, %v1004_v4  ;;  %v670_v36 = vmul.u32 %v668_v51, %v643_v55  ;;  %v671_v43 = vmul.u32 %v667_v46, %v644_v21  ;;  %v569_v31 = vmul.f32 -0.001358992, %v2780_v18 }
 0x199   :  { %v1008_v50 = vclz %v1007_v56  ;;  %v651_v20 = vshll.u32 %v648_v40, 16  ;;  %v653_v59 = vshll.u32 %v649_v35, 16  ;;  %v577_v62 = vadd.f32 0.008332121, %v576_v58 }
 0x19a   :  { %v669_v17 = vmul.u32 %v667_v46, %v643_v55  ;;  %v610_v52 = vshrl.u32 %v2223_v34, %v2702_v61  ;;  %v672_v15 = vmul.u32 %v668_v51, %v644_v21  ;;  %v673_v60 = vshll.u32 %v670_v36, 16 }
 0x19b   :  { %v1969_v37 = vadd.s32 4294967294, %v1008_v50  ;;  %vm655_vm10 = vc.u32 %v647_v48, %v651_v20  ;;  %v657_v32 = vadd.s32 %v651_v20, %v647_v48  ;;  %v675_v22 = vshll.u32 %v671_v43, 16 }
 0x19c   :  { %v656_v53 = vsel %vm655_vm10, 1, %v2229_v3  ;;  %v652_v0 = vshrl.u32 %v648_v40, 16  ;;  %vm677_vm5 = vc.u32 %v669_v17, %v673_v60  ;;  %v679_v28 = vadd.s32 %v673_v60, %v669_v17 }
 0x19d   :  { %vm1970_vm9 = vcmp.lt.s32.totalorder %v1969_v37, 0  ;;  %v658_v47 = vadd.s32 %v656_v53, %v650_v10  ;;  %vm659_vm11 = vc.u32 %v657_v32, %v653_v59  ;;  %v654_v54 = vshrl.u32 %v649_v35, 16 }
 0x19e   :  { %v1011_v14 = vsel %vm1970_vm9, 0, %v1969_v37  ;;  %v660_v55 = vsel %vm659_vm11, 1, %v2229_v3  ;;  %v674_v61 = vshrl.u32 %v670_v36, 16  ;;  %v678_v2 = vsel %vm677_vm5, 1, %v2229_v3 }
 0x19f   :  { %v1012_v42 = vsub.s32 32, %v1011_v14  ;;  %v1013_v57 = vshll.u32 %v1004_v4, %v1011_v14  ;;  %v1016_v41 = vsub.s32 4294967266, %v1011_v14  ;;  %v631_v4 = vsel %vm629_vm1, %v2731_v44, 2102212464 }
 0x1a0   :  { %v662_v34 = vadd.s32 %v660_v55, %v658_v47  ;;  %v680_v51 = vadd.s32 %v678_v2, %v672_v15  ;;  %vm681_vm0 = vc.u32 %v679_v28, %v675_v22  ;;  %v630_v44 = vsel %vm626_vm2, %v610_v52, %v2725_v38 }
 0x1a1   :  { %v1014_v1 = vshrl.u32 %v996_v29, %v1012_v42  ;;  %v1017_v30 = vadd.s32 127, %v1016_v41  ;;  %v632_v40 = vsel %vm628_vm3, %v2729_v39, %v631_v4  ;;  %v682_v35 = vsel %vm681_vm0, 1, %v2229_v3 }
 0x1a2   :  { %v663_v37 = vadd.s32 %v662_v34, %v652_v0  ;;  %v676_v20 = vshrl.u32 %v671_v43, 16  ;;  %v684_v29 = vadd.s32 %v682_v35, %v680_v51  ;;  %v683_v14 = vadd.s32 %v679_v28, %v675_v22 }
 0x1a3   :  { %v1015_v63 = vor.u32 %v1014_v1, %v1013_v57  ;;  %v1018_v56 = vshll.u32 %v1017_v30, 23  ;;  %v570_v36 = vadd.f32 0.041655596, %v569_v31  ;;  %v633_v42 = vsel %vm627_vm7, %v630_v44, %v632_v40 }
 0x1a4   :  { %v664_v10 = vadd.s32 %v663_v37, %v654_v54  ;;  %v685_v39 = vadd.s32 %v684_v29, %v674_v61  ;;  %v852_v57 = vsub.s32 0, %v2792_v23  ;;  %v578_v3 = vmul.f32 %v577_v62, %v2780_v18 }
 0x1a5   :  { %v2783_v25 = vpop.f32.mrf.mxu2  ;;  %v2785_v26 = vpop.f32.mrf.mxu3  ;;  %v1019_v50 = vor.u32 4788187, %v1018_v56  ;;  %v1022_v48 = vcvt.s32.f32 %v1015_v63  ;;  %vm851_vm13 = vcmp.lt.s32.totalorder %v2792_v23, 0  ;;  %v687_v53 = vmul.u32 %v2748_v19, %v633_v42 }
 0x1a6   :  { %1687 = vrot.lane.b32.xlu1 %v2783_v25, %s2230_s2  ;;  %1775 = vrot.lane.b32.xlu0 %v2785_v26, %s2230_s2  ;;  %v686_v59 = vadd.s32 %v685_v39, %v676_v20  ;;  %vm689_vm14 = vc.u32 %v664_v10, %v683_v14  ;;  %v571_v43 = vmul.f32 %v570_v36, %v2780_v18  ;;  %vm904_vm6 = vcmp.lt.s32.totalorder %v2378_v24, 0 }
 0x1a7   :  { %v1020_v58 = vand.u32 2147483647, %v1019_v50  ;;  %v853_v31 = vsel %vm851_vm13, %v852_v57, %v2792_v23  ;;  %v579_v1 = vadd.f32 -0.16666654, %v578_v3  ;;  %v564_v62 = vsub.s32 4, %v2573_v11 }
 0x1a8   :  { %v2796_v5 = vpop.f32.mrf.mxu0  ;;  %v2809_v21 = vpop.f32.mrf.mxu1  ;;  %v690_v27 = vadd.s32 1, %v686_v59  ;;  %v3254_v32 = vand.u32 2147483647, %v2378_v24  ;;  %v854_v15 = vclz %v853_v31  ;;  %v572_v60 = vadd.f32 -0.4999988, %v571_v43 }
 0x1a9   :  { %1683 = vrot.lane.b32.xlu2 %v2796_v5, %s2230_s2  ;;  %v1023_v38 = vmul.f32 %v1022_v48, %v1020_v58  ;;  %v580_v22 = vmul.f32 %v579_v1, %v2780_v18  ;;  %v565_v4 = vsel %vm442_vm12, %v564_v62, %v2573_v11  ;;  %v688_v42 = vadd.s32 %v683_v14, %v664_v10  ;;  %v2890_v62 = vld [vmem:[#allocation8] sm:$0xff] }
 0x1aa   :  { %v691_v52 = vsel %vm689_vm14, %v690_v27, %v686_v59  ;;  %vm2840_vm15 = vcmp.le.f32.partialorder %v3254_v32, 0.7853982  ;;  %v1966_v55 = vadd.s32 4294967294, %v854_v15  ;;  %v573_v28 = vmul.f32 %v572_v60, %v2780_v18 }
 0x1ab   :  { %v1024_v41 = vxor.u32 2147483648, %v1023_v38  ;;  %v692_v30 = vadd.s32 %v691_v52, %v687_v53  ;;  %v2862_v34 = vsel %vm2738_vm4, 0, %v565_v4  ;;  %v581_v61 = vadd.f32 1.0, %v580_v22 }
 0x1ac   :  { %vm1967_vm12 = vcmp.lt.s32.totalorder %v1966_v55, 0  ;;  %v2871_v50 = vadd.f32 1.0, %v573_v28  ;;  %v584_v18 = vand.u32 3, %v2862_v34  ;;  %v842_v27 = vadd.s32 %v2682_v6, %v2677_v33 }
 0x1ad   :  { %v2831_v17 = vpop.f32.mrf.mxu2  ;;  %v1025_v47 = vsel %vm904_vm6, %v1024_v41, %v1023_v38  ;;  %v693_v63 = vadd.s32 536870912, %v692_v30  ;;  %v2858_v54 = vpop.f32.mrf.mxu3  ;;  %v2875_v16 = vmul.f32 %v581_v61, %v2766_v9  ;;  %v857_v40 = vsel %vm1967_vm12, 0, %v1966_v55 }
 0x1ae   :  { %v2853_v0 = vsel %vm2840_vm15, %v2378_v24, %v1025_v47  ;;  %v590_v37 = vxor.u32 2147483648, %v2871_v50  ;;  %vm589_vm2 = vcmp.eq.s32.totalorder %v584_v18, 2  ;;  %vm586_vm3 = vcmp.eq.s32.totalorder %v584_v18, 0 }
 0x1af   :  { %v2855_v56 = vshrl.u32 %v693_v63, 30  ;;  %v2866_v8 = vmul.f32 %v2853_v0, %v2853_v0  ;;  %v587_v58 = vxor.u32 2147483648, %v2875_v16  ;;  %v862_v38 = vsub.s32 4294967266, %v857_v40 }
 0x1b0   :  { %v2811_v46 = vpop.f32.mrf.mxu0  ;;  %vm585_vm4 = vcmp.lt.s32.totalorder %v584_v18, 2  ;;  %v591_v9 = vsel %vm589_vm2, %v590_v37, %v2875_v16  ;;  %v858_v31 = vsub.s32 32, %v857_v40  ;;  %vm583_vm8 = vweird.f32 %v2890_v62  ;;  %v2896_v22 = vpop.f32.mrf.mxu1 }
 0x1b1   :  { %1771 = vrot.lane.b32.xlu2 %v2809_v21, %s2230_s2  ;;  %1685 = vrot.lane.b32.xlu0 %v2811_v46, %s2230_s2  ;;  %v695_v11 = vshll.u32 %v2855_v56, 30  ;;  %v1038_v48 = vmul.f32 -0.00019511016, %v2866_v8  ;;  %v1031_v20 = vmul.f32 -0.001358992, %v2866_v8  ;;  %v588_v39 = vsel %vm586_vm3, %v2871_v50, %v587_v58 }
 0x1b2   :  { %v863_v1 = vadd.s32 127, %v862_v38  ;;  %v592_v10 = vsel %vm585_vm4, %v588_v39, %v591_v9  ;;  %v860_v33 = vshrl.u32 %v842_v27, %v858_v31  ;;  %v1026_v4 = vsub.s32 4, %v2727_v12  ;;  %1773 = vrot.lane.b32.xlu1 %v2896_v22, %s2230_s2 }
 0x1b3   :  { %v696_v2 = vsub.s32 %v692_v30, %v695_v11  ;;  %v1039_v29 = vadd.f32 0.008332121, %v1038_v48  ;;  %v1032_v57 = vadd.f32 0.041655596, %v1031_v20  ;;  %v859_v30 = vshll.u32 %v2792_v23, %v857_v40 }
 0x1b4   :  { %v864_v6 = vshll.u32 %v863_v1, 23  ;;  %v2900_v63 = vsel %vm583_vm8, nan, %v592_v10  ;;  %vm596_vm9 = vcmp.lt.s32.totalorder %v2640_v49, 0  ;;  %vm2923_vm10 = vcmp.le.f32.partialorder %v594_v13, 0.7853982 }
 0x1b5   :  { %vm697_vm1 = vcmp.lt.s32.totalorder %v696_v2, 0  ;;  %v698_v51 = vsub.s32 0, %v696_v2  ;;  %v1040_v3 = vmul.f32 %v1039_v29, %v2866_v8  ;;  %v1033_v32 = vmul.f32 %v1032_v57, %v2866_v8  ;;  %v337_v55 = vpop.f32.mrf.mxu2  ;;  %v366_v28 = vpop.f32.mrf.mxu3 }
 0x1b6   :  { %v2906_v23 = vmul.f32 %v2900_v63, %v337_v55  ;;  %v865_v20 = vor.u32 4788187, %v864_v6  ;;  %v1027_v29 = vsel %vm904_vm6, %v1026_v4, %v2727_v12  ;;  %vm737_vm2 = vweird.f32 %v2640_v49 }
 0x1b7   :  { %v699_v44 = vsel %vm697_vm1, %v698_v51, %v696_v2  ;;  %v1041_v47 = vadd.f32 -0.16666654, %v1040_v3  ;;  %v1034_v48 = vadd.f32 -0.4999988, %v1033_v32  ;;  %v2931_v24 = vsel %vm2840_vm15, 0, %v1027_v29 }
 0x1b8   :  { %v700_v35 = vclz %v699_v44  ;;  %v395_v18 = vpop.f32.mrf.mxu0  ;;  %v2927_v57 = vpop.f32.mrf.mxu1  ;;  %v866_v3 = vand.u32 2147483647, %v865_v20  ;;  %v1046_v31 = vand.u32 3, %v2931_v24 }
 0x1b9   :  { %1689 = vrot.lane.b32.xlu2 %v2831_v17, %s2230_s2  ;;  %v1042_v51 = vmul.f32 %v1041_v47, %v2866_v8  ;;  %v2913_v44 = vmul.f32 %v2900_v63, %v395_v18  ;;  %1743 = vrot.lane.b32.xlu0 %v395_v18, %s2230_s2  ;;  %v1035_v38 = vmul.f32 %v1034_v48, %v2866_v8 }
 0x1ba   :  { %v1963_v36 = vadd.s32 4294967294, %v700_v35  ;;  %v861_v35 = vor.u32 %v860_v33, %v859_v30  ;;  %1803 = vrot.lane.b32.xlu1 %v366_v28, %s2230_s2  ;;  %vm1048_vm11 = vcmp.eq.s32.totalorder %v1046_v31, 0  ;;  %vm1051_vm5 = vcmp.eq.s32.totalorder %v1046_v31, 2 }
 0x1bb   :  { %v1043_v9 = vadd.f32 1.0, %v1042_v51  ;;  %vm1047_vm13 = vcmp.lt.s32.totalorder %v1046_v31, 2 }
 0x1bc   :  { %vm1964_vm7 = vcmp.lt.s32.totalorder %v1963_v36, 0 }
 0x1bd   :  { %v703_v59 = vsel %vm1964_vm7, 0, %v1963_v36  ;;  %v2934_v12 = vpop.f32.mrf.mxu2  ;;  %v2936_v8 = vpop.f32.mrf.mxu3  ;;  %v2947_v19 = vmul.f32 %v1043_v9, %v2853_v0 }
 0x1be   :  { %v704_v41 = vsub.s32 32, %v703_v59  ;;  %v705_v53 = vshll.u32 %v696_v2, %v703_v59  ;;  %v708_v43 = vsub.s32 4294967266, %v703_v59  ;;  %v2909_v2 = vmul.f32 %v2900_v63, %v366_v28 }
 0x1bf   :  { %v868_v59 = vcvt.s32.f32 %v861_v35  ;;  %v1049_v32 = vxor.u32 2147483648, %v2947_v19  ;;  %v3259_v35 = vand.u32 2147483647, %v2357_v7 }
 0x1c0   :  { %v706_v14 = vshrl.u32 %v688_v42, %v704_v41  ;;  %v709_v52 = vadd.s32 127, %v708_v43  ;;  %v2942_v41 = vpop.f32.mrf.mxu0  ;;  %v718_v43 = vsub.s32 4, %v2855_v56 }
 0x1c1   :  { %1777 = vrot.lane.b32.xlu2 %v2858_v54, %s2230_s2  ;;  %1715 = vrot.lane.b32.xlu0 %v337_v55, %s2230_s2  ;;  %v869_v10 = vmul.f32 %v868_v59, %v866_v3  ;;  %v2968_v55 = vld [vmem:[#allocation8 + $0x10] sm:$0xff]  ;;  %vm2991_vm14 = vcmp.le.f32.partialorder %v3259_v35, 0.7853982  ;;  %v1200_v35 = vadd.s32 3, %v2862_v34  ;;  %v1676_v34 = vlaneseq }
 0x1c2   :  { %v707_v15 = vor.u32 %v706_v14, %v705_v53  ;;  %v710_v60 = vshll.u32 %v709_v52, 23  ;;  %v2944_v53 = vadd.f32 1.0, %v1035_v38  ;;  %v719_v0 = vsel %vm596_vm9, %v718_v43, %v2855_v56  ;;  %v2998_v38 = vld [vmem:[#allocation8 + $0x18] sm:$0xff] }
 0x1c3   :  { %v870_v33 = vxor.u32 2147483648, %v869_v10  ;;  %vm750_vm0 = vcmp.lt.s32.totalorder %v2968_v55, 0  ;;  %v2973_v56 = vsel %vm2923_vm10, 0, %v719_v0  ;;  %vm1045_vm6 = vweird.f32 %v2998_v38 }
 0x1c4   :  { %v711_v61 = vor.u32 4788187, %v710_v60  ;;  %v714_v11 = vcvt.s32.f32 %v707_v15  ;;  %v1052_v47 = vxor.u32 2147483648, %v2944_v53  ;;  %v2960_v60 = vpop.f32.mrf.mxu1  ;;  %v1050_v18 = vsel %vm1048_vm11, %v2944_v53, %v1049_v32 }
 0x1c5   :  { %v2962_v6 = vpop.f32.mrf.mxu2  ;;  %v2964_v4 = vpop.f32.mrf.mxu3  ;;  %v871_v29 = vsel %vm750_vm0, %v870_v33, %v869_v10 }
 0x1c6   :  { %v712_v40 = vand.u32 2147483647, %v711_v61  ;;  %v1053_v48 = vsel %vm1051_vm5, %v1052_v47, %v2947_v19  ;;  %v3004_v7 = vsel %vm2991_vm14, %v2968_v55, %v871_v29 }
 0x1c7   :  { %v1054_v9 = vsel %vm1047_vm13, %v1050_v18, %v1053_v48 }
 0x1c8   :  { %v715_v36 = vmul.f32 %v714_v11, %v712_v40  ;;  %v2975_v11 = vpop.f32.mrf.mxu0  ;;  %v3012_v43 = vsel %vm1045_vm6, nan, %v1054_v9 }
 0x1c9   :  { %1831 = vrot.lane.b32.xlu2 %v2927_v57, %s2230_s2  ;;  %1747 = vrot.lane.b32.xlu1 %v2975_v11, %s2230_s2 }
 0x1ca   :  { %v716_v39 = vxor.u32 2147483648, %v715_v36  ;;  %1805 = vrot.lane.b32.xlu0 %v2936_v8, %s2230_s2 }
 0x1cc   :  { %v717_v13 = vsel %vm596_vm9, %v716_v39, %v715_v36  ;;  %v738_v36 = vand.u32 3, %v2973_v56 }
 0x1cd   :  { %v720_v27 = vsel %vm2923_vm10, %v2640_v49, %v717_v13  ;;  %v3008_v13 = vpop.f32.mrf.mxu1  ;;  %v346_v31 = vpop.f32.mrf.mxu2  ;;  %v1827_v49 = vmul.f32 %v2900_v63, %v2927_v57 }
 0x1ce   :  { %v722_v1 = vmul.f32 %v720_v27, %v720_v27  ;;  %vm743_vm15 = vcmp.eq.s32.totalorder %v738_v36, 2  ;;  %v375_v10 = vpop.f32.mrf.mxu3  ;;  %vm740_vm12 = vcmp.eq.s32.totalorder %v738_v36, 0  ;;  %vm739_vm1 = vcmp.lt.s32.totalorder %v738_v36, 2 }
 0x1cf   :  { %v3023_v0 = vmul.f32 %v3012_v43, %v375_v10 }
 0x1d0   :  { %v723_v14 = vmul.f32 -0.001358992, %v722_v1  ;;  %v730_v52 = vmul.f32 -0.00019511016, %v722_v1 }
 0x1d1   :  { %1745 = vrot.lane.b32.xlu2 %v2942_v41, %s2230_s2  ;;  %1719 = vrot.lane.b32.xlu1 %v2962_v6, %s2230_s2 }
 0x1d2   :  { %v724_v30 = vadd.f32 0.041655596, %v723_v14  ;;  %v731_v15 = vadd.f32 0.008332121, %v730_v52  ;;  %v3020_v52 = vmul.f32 %v3012_v43, %v346_v31 }
 0x1d4   :  { %v725_v28 = vmul.f32 %v724_v30, %v722_v1  ;;  %v732_v61 = vmul.f32 %v731_v15, %v722_v1  ;;  %v404_v30 = vpop.f32.mrf.mxu0  ;;  %v876_v15 = vmul.f32 %v3004_v7, %v3004_v7 }
 0x1d5   :  { %v3028_v33 = vmul.f32 %v3012_v43, %v404_v30  ;;  %1749 = vrot.lane.b32.xlu0 %v404_v30, %s2230_s2 }
 0x1d6   :  { %v726_v51 = vadd.f32 -0.4999988, %v725_v28  ;;  %v733_v40 = vadd.f32 -0.16666654, %v732_v61  ;;  %v884_v18 = vmul.f32 -0.00019511016, %v876_v15 }
 0x1d7   :  { %v877_v9 = vmul.f32 -0.001358992, %v876_v15 }
 0x1d8   :  { %v727_v42 = vmul.f32 %v726_v51, %v722_v1  ;;  %v734_v39 = vmul.f32 %v733_v40, %v722_v1  ;;  %v433_v51 = vpop.f32.mrf.mxu1 }
 0x1d9   :  { %1717 = vrot.lane.b32.xlu2 %v2934_v12, %s2230_s2  ;;  %v3054_v36 = vmul.f32 %v3012_v43, %v433_v51  ;;  %1809 = vrot.lane.b32.xlu1 %v375_v10, %s2230_s2 }
 0x1da   :  { %v3006_v3 = vadd.f32 1.0, %v727_v42  ;;  %v735_v59 = vadd.f32 1.0, %v734_v39  ;;  %v885_v42 = vadd.f32 0.008332121, %v884_v18  ;;  %v1201_v39 = vand.u32 3, %v1200_v35 }
 0x1db   :  { %v3069_v18 = vand.u32 127, %v1676_v34 }
 0x1dc   :  { %v3016_v1 = vmul.f32 %v735_v59, %v720_v27  ;;  %v744_v14 = vxor.u32 2147483648, %v3006_v3  ;;  %v878_v59 = vadd.f32 0.041655596, %v877_v9  ;;  %v886_v30 = vmul.f32 %v885_v42, %v876_v15 }
 0x1dd   :  { %1721 = vrot.lane.b32.xlu0 %v346_v31, %s2230_s2  ;;  %vm1203_vm3 = vcmp.eq.s32.totalorder %v1201_v39, 0  ;;  %vm1206_vm4 = vcmp.eq.s32.totalorder %v1201_v39, 2  ;;  %vm1202_vm7 = vcmp.lt.s32.totalorder %v1201_v39, 2  ;;  %vm1678_vm9 = vcmp.lt.s32.totalorder %v3069_v18, 64 }
 0x1de   :  { %v741_v27 = vxor.u32 2147483648, %v3016_v1  ;;  %v745_v28 = vsel %vm743_vm15, %v744_v14, %v3016_v1  ;;  %v1205_v31 = vsel %vm1203_vm3, %v2871_v50, %v587_v58  ;;  %v1208_v10 = vsel %vm1206_vm4, %v590_v37, %v2875_v16 }
 0x1df   :  { %v1209_v9 = vsel %vm1202_vm7, %v1205_v31, %v1208_v10  ;;  %v1665_v42 = vadd.s32 3, %v2931_v24  ;;  %v1679_v24 = vmul.f32 %v2900_v63, %v2796_v5 }
 0x1e0   :  { %v742_v61 = vsel %vm740_vm12, %v3006_v3, %v741_v27  ;;  %v3079_v50 = vsel %vm583_vm8, nan, %v1209_v9 }
 0x1e1   :  { %v746_v48 = vsel %vm739_vm1, %v742_v61, %v745_v28  ;;  %1807 = vrot.lane.b32.xlu2 %v2964_v4, %s2230_s2  ;;  %v879_v28 = vmul.f32 %v878_v59, %v876_v15  ;;  %v887_v61 = vadd.f32 -0.16666654, %v886_v30  ;;  %1833 = vrot.lane.b32.xlu1 %v2960_v60, %s2230_s2  ;;  %vm891_vm1 = vweird.f32 %v2968_v55 }
 0x1e2   :  { %v3044_v40 = vsel %vm737_vm2, nan, %v746_v48  ;;  %v872_v48 = vsub.s32 4, %v2761_v45 }
 0x1e3   :  { %v3051_v29 = vmul.f32 %v3044_v40, %v2960_v60  ;;  %v888_v35 = vmul.f32 %v887_v61, %v876_v15 }
 0x1e4   :  { %v873_v58 = vsel %vm750_vm0, %v872_v48, %v2761_v45 }
 0x1e5   :  { %1835 = vrot.lane.b32.xlu0 %v3008_v13, %s2230_s2  ;;  %v889_v39 = vadd.f32 1.0, %v888_v35  ;;  %v875_v30 = vsel %vm2991_vm14, 0, %v873_v58 }
 0x1e6   :  { %v1510_v45 = vadd.s32 3, %v875_v30  ;;  %v892_v10 = vand.u32 3, %v875_v30 }
 0x1e7   :  { %v890_v62 = vmul.f32 %v889_v39, %v3004_v7 }
 0x1e8   :  { %v1511_v35 = vand.u32 3, %v1510_v45  ;;  %vm894_vm5 = vcmp.eq.s32.totalorder %v892_v10, 0  ;;  %vm897_vm0 = vcmp.eq.s32.totalorder %v892_v10, 2  ;;  %vm893_vm15 = vcmp.lt.s32.totalorder %v892_v10, 2 }
 0x1e9   :  { %1837 = vrot.lane.b32.xlu2 %v433_v51, %s2230_s2  ;;  %v880_v51 = vadd.f32 -0.4999988, %v879_v28  ;;  %v1666_v28 = vand.u32 3, %v1665_v42  ;;  %v895_v20 = vxor.u32 2147483648, %v890_v62  ;;  %v1767_v42 = vmul.f32 %v2900_v63, %v2809_v21 }
 0x1ea   :  { %vm1513_vm13 = vcmp.eq.s32.totalorder %v1511_v35, 0  ;;  %vm1516_vm14 = vcmp.eq.s32.totalorder %v1511_v35, 2  ;;  %vm1512_vm12 = vcmp.lt.s32.totalorder %v1511_v35, 2  ;;  %v1682_v45 = vmul.f32 %v3012_v43, %v2831_v17 }
 0x1eb   :  { %v881_v37 = vmul.f32 %v880_v51, %v876_v15  ;;  %vm1668_vm8 = vcmp.eq.s32.totalorder %v1666_v28, 0  ;;  %vm1671_vm10 = vcmp.eq.s32.totalorder %v1666_v28, 2  ;;  %vm1667_vm11 = vcmp.lt.s32.totalorder %v1666_v28, 2 }
 0x1ec   :  { %v1673_v7 = vsel %vm1671_vm10, %v1052_v47, %v2947_v19 }
 0x1ed   :  { %v882_v61 = vadd.f32 1.0, %v881_v37 }
 0x1ef   :  { %v898_v9 = vxor.u32 2147483648, %v882_v61  ;;  %v896_v39 = vsel %vm894_vm5, %v882_v61, %v895_v20 }
 0x203   :  { %v1684_v60 = vpop.permute.xlu2 %1683 }
 0x204   :  { %v1691_v16 = vsub.f32 0.0, %v1684_v60 }
 0x206   :  { %v1695_v59 = vsel %vm1678_vm9, %v1691_v16, %v1684_v60  ;;  %v1670_v60 = vsel %vm1668_vm8, %v2944_v53, %v1049_v32  ;;  %v1518_v53 = vsel %vm1516_vm14, %v898_v9, %v890_v62 }
 0x207   :  { %v1699_v34 = vmul.f32 %v1695_v59, %v3079_v50  ;;  %v1674_v37 = vsel %vm1667_vm11, %v1670_v60, %v1673_v7  ;;  %v899_v59 = vsel %vm897_vm0, %v898_v9, %v890_v62 }
 0x208   :  { %v3102_v19 = vsel %vm1045_vm6, nan, %v1674_v37  ;;  %v900_v21 = vsel %vm893_vm15, %v896_v39, %v899_v59  ;;  %v1770_v37 = vmul.f32 %v3012_v43, %v2858_v54  ;;  %v1355_v59 = vadd.s32 3, %v2973_v56 }
 0x209   :  { %v1703_v31 = vadd.f32 %v1699_v34, %v1679_v24  ;;  %v1515_v24 = vsel %vm1513_vm13, %v882_v61, %v895_v20  ;;  %v3110_v61 = vsel %vm891_vm1, nan, %v900_v21 }
 0x20a   :  { %v1519_v28 = vsel %vm1512_vm12, %v1515_v24, %v1518_v53  ;;  %v1356_v53 = vand.u32 3, %v1355_v59 }
 0x20b   :  { %v1707_v15 = vmul.f32 0.088388346, %v1703_v31  ;;  %v1772_v48 = vpop.permute.xlu2 %1771 }
 0x20c   :  { %v1779_v51 = vsub.f32 0.0, %v1772_v48  ;;  %vm1358_vm6 = vcmp.eq.s32.totalorder %v1356_v53, 0  ;;  %vm1361_vm3 = vcmp.eq.s32.totalorder %v1356_v53, 2  ;;  %vm1357_vm4 = vcmp.lt.s32.totalorder %v1356_v53, 2 }
 0x20d   :  { %1855 = vst [vmem:[#allocation10] sm:$0xff] %v1707_v15  ;;  %v3112_v15 = vsel %vm891_vm1, nan, %v1519_v28  ;;  %v1363_v54 = vsel %vm1361_vm3, %v744_v14, %v3016_v1 }
 0x20e   :  { %v1783_v5 = vsel %vm1678_vm9, %v1779_v51, %v1772_v48  ;;  %v1681_v51 = vmul.f32 %v3110_v61, %v2783_v25 }
 0x20f   :  { %v1787_v58 = vmul.f32 %v1783_v5, %v3079_v50  ;;  %v1769_v5 = vmul.f32 %v3110_v61, %v2785_v26 }
 0x211   :  { %v1791_v16 = vadd.f32 %v1787_v58, %v1767_v42 }
 0x213   :  { %v1795_v30 = vmul.f32 0.088388346, %v1791_v16  ;;  %v1690_v32 = vpop.permute.xlu2 %1689 }
 0x214   :  { %v1694_v47 = vsub.f32 0.0, %v1690_v32 }
 0x215   :  { %1856 = vst [vmem:[#allocation10 + $0x8] sm:$0xff] %v1795_v30 }
 0x216   :  { %v1698_v34 = vsel %vm1678_vm9, %v1694_v47, %v1690_v32  ;;  %v1360_v47 = vsel %vm1358_vm6, %v3006_v3, %v741_v27 }
 0x217   :  { %v1702_v31 = vmul.f32 %v1698_v34, %v3102_v19  ;;  %v1364_v56 = vsel %vm1357_vm4, %v1360_v47, %v1363_v54 }
 0x218   :  { %v1688_v62 = vpop.permute.xlu1 %1687  ;;  %v1776_v38 = vpop.permute.xlu0 %1775  ;;  %v3138_v21 = vsel %vm737_vm2, nan, %v1364_v56 }
 0x219   :  { %v1706_v10 = vadd.f32 %v1702_v31, %v1682_v45  ;;  %v1693_v48 = vsub.f32 0.0, %v1688_v62  ;;  %v1781_v55 = vsub.f32 0.0, %v1776_v38  ;;  %v1680_v45 = vmul.f32 %v3044_v40, %v2811_v46 }
 0x21b   :  { %v1710_v35 = vmul.f32 0.088388346, %v1706_v10  ;;  %v1697_v20 = vsel %vm1678_vm9, %v1693_v48, %v1688_v62  ;;  %v1785_v17 = vsel %vm1678_vm9, %v1781_v55, %v1776_v38  ;;  %v1778_v9 = vpop.permute.xlu2 %1777 }
 0x21c   :  { %v1701_v60 = vmul.f32 %v1697_v20, %v3112_v15  ;;  %v1789_v7 = vmul.f32 %v1785_v17, %v3112_v15  ;;  %v1782_v42 = vsub.f32 0.0, %v1778_v9 }
 0x21d   :  { %1861 = vst [vmem:[#allocation10 + $0x30] sm:$0xff] %v1710_v35 }
 0x21e   :  { %v1705_v58 = vadd.f32 %v1701_v60, %v1681_v51  ;;  %v1793_v16 = vadd.f32 %v1789_v7, %v1769_v5  ;;  %v1786_v25 = vsel %vm1678_vm9, %v1782_v42, %v1778_v9  ;;  %v1740_v51 = vmul.f32 %v3044_v40, %v2942_v41 }
 0x21f   :  { %v1790_v39 = vmul.f32 %v1786_v25, %v3102_v19  ;;  %v1712_v41 = vmul.f32 %v3044_v40, %v2934_v12 }
 0x220   :  { %v1709_v30 = vmul.f32 0.088388346, %v1705_v58  ;;  %v1797_v26 = vmul.f32 0.088388346, %v1793_v16  ;;  %v1768_v58 = vmul.f32 %v3044_v40, %v2896_v22 }
 0x221   :  { %v1794_v32 = vadd.f32 %v1790_v39, %v1770_v37 }
 0x222   :  { %1859 = vst [vmem:[#allocation10 + $0x20] sm:$0xff] %v1709_v30 }
 0x223   :  { %1860 = vst [vmem:[#allocation10 + $0x28] sm:$0xff] %v1797_v26  ;;  %v1798_v24 = vmul.f32 0.088388346, %v1794_v32  ;;  %v1686_v43 = vpop.permute.xlu0 %1685  ;;  %v1832_v27 = vpop.permute.xlu2 %1831 }
 0x224   :  { %v1692_v34 = vsub.f32 0.0, %v1686_v43  ;;  %v1839_v38 = vsub.f32 0.0, %v1832_v27  ;;  %v1774_v17 = vpop.permute.xlu1 %1773 }
 0x225   :  { %1862 = vst [vmem:[#allocation10 + $0x38] sm:$0xff] %v1798_v24  ;;  %v1780_v63 = vsub.f32 0.0, %v1774_v17 }
 0x226   :  { %v1696_v28 = vsel %vm1678_vm9, %v1692_v34, %v1686_v43  ;;  %v1843_v1 = vsel %vm1678_vm9, %v1839_v38, %v1832_v27 }
 0x227   :  { %v1700_v31 = vmul.f32 %v1696_v28, %v3138_v21  ;;  %v1847_v14 = vmul.f32 %v1843_v1, %v3079_v50  ;;  %v1784_v60 = vsel %vm1678_vm9, %v1780_v63, %v1774_v17 }
 0x228   :  { %v1788_v16 = vmul.f32 %v1784_v60, %v3138_v21 }
 0x229   :  { %v1704_v62 = vadd.f32 %v1700_v31, %v1680_v45  ;;  %v1851_v10 = vadd.f32 %v1847_v14, %v1827_v49 }
 0x22a   :  { %v1792_v39 = vadd.f32 %v1788_v16, %v1768_v58 }
 0x22b   :  { %v1708_v3 = vmul.f32 0.088388346, %v1704_v62  ;;  %1872 = vst [vmem:[#allocation13 + $0x8] sm:$0xff] %v1851_v10  ;;  %v1746_v48 = vpop.permute.xlu2 %1745  ;;  %v1744_v5 = vpop.permute.xlu0 %1743 }
 0x22c   :  { %v1752_v55 = vsub.f32 0.0, %v1746_v48  ;;  %v1751_v7 = vsub.f32 0.0, %v1744_v5  ;;  %v1796_v30 = vmul.f32 0.088388346, %v1792_v39  ;;  %v1804_v26 = vpop.permute.xlu1 %1803 }
 0x22d   :  { %1857 = vst [vmem:[#allocation10 + $0x10] sm:$0xff] %v1708_v3  ;;  %v1811_v24 = vsub.f32 0.0, %v1804_v26 }
 0x22e   :  { %v1756_v46 = vsel %vm1678_vm9, %v1752_v55, %v1746_v48  ;;  %v1755_v37 = vsel %vm1678_vm9, %v1751_v7, %v1744_v5  ;;  %1858 = vst [vmem:[#allocation10 + $0x18] sm:$0xff] %v1796_v30 }
 0x22f   :  { %v1760_v35 = vmul.f32 %v1756_v46, %v3138_v21  ;;  %v1759_v59 = vmul.f32 %v1755_v37, %v3079_v50  ;;  %v1815_v54 = vsel %vm1678_vm9, %v1811_v24, %v1804_v26  ;;  %1891 = dma.vmem_to_hbm [thread:$0]  %s1884_s24, 1024, %s1886_s27, [#allocation4], %s2232_s5, %s2232_s5, %s2233_s28   ;;  %v1800_v46 = vmul.f32 %v3044_v40, %v2936_v8 }
 0x230   :  { %v1819_v34 = vmul.f32 %v1815_v54, %v3079_v50  ;;  %v1713_v40 = vmul.f32 %v3110_v61, %v2962_v6 }
 0x231   :  { %v1764_v20 = vadd.f32 %v1760_v35, %v1740_v51  ;;  %v1763_v12 = vadd.f32 %v1759_v59, %v2913_v44  ;;  %v1801_v44 = vmul.f32 %v3110_v61, %v2964_v4 }
 0x232   :  { %v1823_v31 = vadd.f32 %v1819_v34, %v2909_v2  ;;  %v1741_v2 = vmul.f32 %v3110_v61, %v2975_v11 }
 0x233   :  { %1873 = vst [vmem:[#allocation13 + $0x10] sm:$0xff] %v1764_v20  ;;  %v1718_v9 = vpop.permute.xlu2 %1717  ;;  %v1716_v47 = vpop.permute.xlu0 %1715 }
 0x234   :  { %v1724_v57 = vsub.f32 0.0, %v1718_v9  ;;  %1871 = vst [vmem:[#allocation13] sm:$0xff] %v1763_v12  ;;  %v1723_v56 = vsub.f32 0.0, %v1716_v47 }
 0x235   :  { %1864 = vst [vmem:[#allocation11 + $0x8] sm:$0xff] %v1823_v31 }
 0x236   :  { %v1728_v42 = vsel %vm1678_vm9, %v1724_v57, %v1718_v9  ;;  %v1727_v45 = vsel %vm1678_vm9, %v1723_v56, %v1716_v47 }
 0x237   :  { %v1732_v25 = vmul.f32 %v1728_v42, %v3138_v21  ;;  %v1731_v27 = vmul.f32 %v1727_v45, %v3079_v50 }
 0x239   :  { %v1736_v22 = vadd.f32 %v1732_v25, %v1712_v41  ;;  %v1735_v38 = vadd.f32 %v1731_v27, %v2906_v23 }
 0x23b   :  { %1865 = vst [vmem:[#allocation11 + $0x10] sm:$0xff] %v1736_v22  ;;  %v1808_v32 = vpop.permute.xlu2 %1807  ;;  %v1748_v4 = vpop.permute.xlu1 %1747 }
 0x23c   :  { %v1813_v53 = vsub.f32 0.0, %v1808_v32  ;;  %1863 = vst [vmem:[#allocation11] sm:$0xff] %v1735_v38  ;;  %v1806_v49 = vpop.permute.xlu0 %1805  ;;  %v1753_v14 = vsub.f32 0.0, %v1748_v4 }
 0x23d   :  { %v1812_v10 = vsub.f32 0.0, %v1806_v49 }
 0x23e   :  { %v1817_v43 = vsel %vm1678_vm9, %v1813_v53, %v1808_v32  ;;  %v1757_v50 = vsel %vm1678_vm9, %v1753_v14, %v1748_v4 }
 0x23f   :  { %v1821_v28 = vmul.f32 %v1817_v43, %v3112_v15  ;;  %v1816_v23 = vsel %vm1678_vm9, %v1812_v10, %v1806_v49  ;;  %v1761_v51 = vmul.f32 %v1757_v50, %v3112_v15 }
 0x240   :  { %v1820_v35 = vmul.f32 %v1816_v23, %v3138_v21 }
 0x241   :  { %v1825_v62 = vadd.f32 %v1821_v28, %v1801_v44  ;;  %v1765_v17 = vadd.f32 %v1761_v51, %v1741_v2 }
 0x242   :  { %v1824_v9 = vadd.f32 %v1820_v35, %v1800_v46 }
 0x243   :  { %v1838_v3 = vpop.permute.xlu2 %1837  ;;  %1868 = vst [vmem:[#allocation11 + $0x28] sm:$0xff] %v1825_v62  ;;  %v1720_v11 = vpop.permute.xlu1 %1719 }
 0x244   :  { %v1842_v1 = vsub.f32 0.0, %v1838_v3  ;;  %1875 = vst [vmem:[#allocation13 + $0x20] sm:$0xff] %v1765_v17  ;;  %v1725_v57 = vsub.f32 0.0, %v1720_v11 }
 0x245   :  { %1866 = vst [vmem:[#allocation11 + $0x18] sm:$0xff] %v1824_v9 }
 0x246   :  { %v1846_v48 = vsel %vm1678_vm9, %v1842_v1, %v1838_v3  ;;  %v1729_v60 = vsel %vm1678_vm9, %v1725_v57, %v1720_v11 }
 0x247   :  { %v1850_v55 = vmul.f32 %v1846_v48, %v3102_v19  ;;  %v1750_v63 = vpop.permute.xlu0 %1749 }
 0x248   :  { %v1754_v5 = vsub.f32 0.0, %v1750_v63 }
 0x249   :  { %v1854_v20 = vadd.f32 %v1850_v55, %v3054_v36  ;;  %v1733_v36 = vmul.f32 %v1729_v60, %v3112_v15 }
 0x24a   :  { %v1758_v8 = vsel %vm1678_vm9, %v1754_v5, %v1750_v63 }
 0x24b   :  { %1878 = vst [vmem:[#allocation13 + $0x38] sm:$0xff] %v1854_v20  ;;  %v1762_v7 = vmul.f32 %v1758_v8, %v3102_v19  ;;  %v1737_v42 = vadd.f32 %v1733_v36, %v1713_v40  ;;  %v1810_v41 = vpop.permute.xlu1 %1809 }
 0x24c   :  { %v1814_v25 = vsub.f32 0.0, %v1810_v41 }
 0x24d   :  { %v1766_v58 = vadd.f32 %v1762_v7, %v3028_v33  ;;  %1867 = vst [vmem:[#allocation11 + $0x20] sm:$0xff] %v1737_v42 }
 0x24e   :  { %v1818_v39 = vsel %vm1678_vm9, %v1814_v25, %v1810_v41 }
 0x24f   :  { %v1722_v16 = vpop.permute.xlu0 %1721  ;;  %1877 = vst [vmem:[#allocation13 + $0x30] sm:$0xff] %v1766_v58  ;;  %v1822_v6 = vmul.f32 %v1818_v39, %v3102_v19 }
 0x250   :  { %v1726_v37 = vsub.f32 0.0, %v1722_v16 }
 0x251   :  { %v1826_v33 = vadd.f32 %v1822_v6, %v3023_v0 }
 0x252   :  { %v1730_v59 = vsel %vm1678_vm9, %v1726_v37, %v1722_v16 }
 0x253   :  { %v1734_v22 = vmul.f32 %v1730_v59, %v3102_v19  ;;  %1870 = vst [vmem:[#allocation11 + $0x38] sm:$0xff] %v1826_v33  ;;  %v1834_v26 = vpop.permute.xlu1 %1833 }
 0x254   :  { %v1840_v32 = vsub.f32 0.0, %v1834_v26 }
 0x255   :  { %v1738_v30 = vadd.f32 %v1734_v22, %v3020_v52  ;;  %v1829_v52 = vmul.f32 %v3110_v61, %v3008_v13 }
 0x256   :  { %v1844_v19 = vsel %vm1678_vm9, %v1840_v32, %v1834_v26 }
 0x257   :  { %v1836_v12 = vpop.permute.xlu0 %1835  ;;  %1869 = vst [vmem:[#allocation11 + $0x30] sm:$0xff] %v1738_v30  ;;  %v1848_v53 = vmul.f32 %v1844_v19, %v3138_v21 }
 0x258   :  { %v1841_v24 = vsub.f32 0.0, %v1836_v12  ;;  %1904 = dma.vmem_to_hbm [thread:$0]  %s1897_s30, 1024, %s1899_s10, [#allocation12], %s2232_s5, %s2232_s5, %s2233_s28  }
 0x259   :  { %v1852_v54 = vadd.f32 %v1848_v53, %v3051_v29 }
 0x25a   :  { %v1845_v0 = vsel %vm1678_vm9, %v1841_v24, %v1836_v12 }
 0x25b   :  { %v1849_v47 = vmul.f32 %v1845_v0, %v3112_v15  ;;  %1874 = vst [vmem:[#allocation13 + $0x18] sm:$0xff] %v1852_v54 }
 0x25d   :  { %v1853_v56 = vadd.f32 %v1849_v47, %v1829_v52 }
 0x25f   :  { %1876 = vst [vmem:[#allocation13 + $0x28] sm:$0xff] %v1853_v56 }
 0x260   :  { %1917 = dma.vmem_to_hbm [thread:$0]  %s1910_s11, 1024, %s1912_s14, [#allocation12], %s2232_s5, %s2232_s5, %s2233_s28  }
 0x261   :  { %2210 = dma.done.wait [#allocation4], 1024  }
 0x262   :  { %2211 = vsyncadd [#allocation4], 4294966272 }
 0x263   :  { %2212 = dma.done.wait [#allocation12], 2048  }
 0x264   :  { %2213 = vsyncadd [#allocation12], 4294965248 }
 0x265   :  { %1930 = vsyncpa [#allocation3], 1 }
 0x266   :  { %1931 = vsyncpa [#allocation6], 1 }
 0x267   :  { %1932 = vsyncpa [#allocation9], 1 }
 0x268   :  { %1933 = vsyncpa [#allocation4], 1 }
 0x269   :  { %1934 = vsyncpa [#allocation12], 1 }

</bundles_post_ra>
